<compile_context>
chip_gen: v7x
topology: tpu7x:2x2x1
jax: 0.10.0
libtpu: 0.0.40
codegen_flags: <defaults>
</compile_context>

<pallas_src>
import functools

import jax
import jax.numpy as jnp
from jax import lax
from jax.experimental import pallas as pl
from jax.experimental.pallas import tpu as pltpu

EPS = 1e-5                      # nn.BatchNorm2d default
VMEM_LIMIT_BYTES = 32 * 1024 * 1024


# ------------------------------- Pallas kernel -------------------------------

def fused_double_conv_kernel(x_ref, wb1_ref, wb2_ref,
                             g1_ref, b1_ref, g2_ref, b2_ref,
                             sel1_ref, selT1_ref, sel2_ref, selT2_ref,
                             out_ref,
                             xpad_ref, ypad_ref,
                             *, N, H, W, Cin, Cmid, Cout, K, pad):
    """Whole double-conv block in one kernel invocation.

    Inputs (all f32):
      x_ref     (N, H, W*Cin)        lane-packed input rows
      wb1_ref   (K, W*Cin,  W*Cmid)  banded conv1 weights (kx + col-pad folded in)
      wb2_ref   (K, W*Cmid, W*Cout)  banded conv2 weights
      g*/b*     (1, C)               BatchNorm affine params
      sel*      (W*C, C)             per-channel reduction matrix
      selT*     (C, W*C)             per-channel broadcast matrix
    Output:
      out_ref   (N*H, W*Cout)        lane-dense activated output rows
    Scratch:
      xpad_ref  (N, H+2*pad, W*Cin)  row-padded input
      ypad_ref  (N, H+2*pad, W*Cmid) row-padded BN1+ReLU activations
    """
    WCin, WCmid, WCout = W * Cin, W * Cmid, W * Cout
    Hp = H + 2 * pad
    inv_count = 1.0 / float(N * H * W)

    # ---- stage 0: row-pad the input (halo-only zeroing; interior is one
    #      full-width aligned store; column padding lives in the banded weights)
    xpad_ref[:, 0:pad, :] = jnp.zeros((N, pad, WCin), jnp.float32)
    xpad_ref[:, pad + H:Hp, :] = jnp.zeros((N, pad, WCin), jnp.float32)
    xpad_ref[:, pad:pad + H, :] = x_ref[...].astype(jnp.float32)

    # ---- stage 1: conv1 as K banded matmuls per batch element + BN1 partials
    wb1 = [wb1_ref[ky] for ky in range(K)]
    rsum1 = jnp.zeros((1, WCmid), jnp.float32)
    rsq1 = jnp.zeros((1, WCmid), jnp.float32)
    y1 = []
    for n in range(N):
        acc = jnp.zeros((H, WCmid), jnp.float32)
        for ky in range(K):
            acc = acc + jnp.dot(xpad_ref[n, ky:ky + H, :], wb1[ky],
                                preferred_element_type=jnp.float32)
        y1.append(acc)
        rsum1 = rsum1 + jnp.sum(acc, axis=0, keepdims=True)
        rsq1 = rsq1 + jnp.sum(acc * acc, axis=0, keepdims=True)

    # Training-mode BatchNorm (biased variance over N,H,W), per channel, then
    # broadcast back to the lane-packed (1, W*C) pattern via the sel matrices.
    # NOTE: E[x^2]-E[x]^2 in f32 is fine at this scale (see review concern).
    def bn_scale_shift(rsum, rsq, sel, selT, gamma, beta):
        csum = jnp.dot(rsum, sel, preferred_element_type=jnp.float32)   # (1, C)
        csq = jnp.dot(rsq, sel, preferred_element_type=jnp.float32)     # (1, C)
        mean = csum * inv_count
        var = jnp.maximum(csq * inv_count - mean * mean, 0.0)
        scale_c = gamma / jnp.sqrt(var + EPS)                           # (1, C)
        shift_c = beta - mean * scale_c                                 # (1, C)
        scale_l = jnp.dot(scale_c, selT, preferred_element_type=jnp.float32)
        shift_l = jnp.dot(shift_c, selT, preferred_element_type=jnp.float32)
        return scale_l, shift_l                                         # (1, W*C)

    sc1, sh1 = bn_scale_shift(rsum1, rsq1, sel1_ref[...], selT1_ref[...],
                              g1_ref[...], b1_ref[...])

    # ---- stage 2: BN1 + ReLU, written straight into conv2's row-padded input
    ypad_ref[:, 0:pad, :] = jnp.zeros((N, pad, WCmid), jnp.float32)
    ypad_ref[:, pad + H:Hp, :] = jnp.zeros((N, pad, WCmid), jnp.float32)
    for n in range(N):
        ypad_ref[n, pad:pad + H, :] = jnp.maximum(y1[n] * sc1 + sh1, 0.0)

    # ---- stage 3: conv2 + BN2 partials
    wb2 = [wb2_ref[ky] for ky in range(K)]
    rsum2 = jnp.zeros((1, WCout), jnp.float32)
    rsq2 = jnp.zeros((1, WCout), jnp.float32)
    y2 = []
    for n in range(N):
        acc = jnp.zeros((H, WCout), jnp.float32)
        for ky in range(K):
            acc = acc + jnp.dot(ypad_ref[n, ky:ky + H, :], wb2[ky],
                                preferred_element_type=jnp.float32)
        y2.append(acc)
        rsum2 = rsum2 + jnp.sum(acc, axis=0, keepdims=True)
        rsq2 = rsq2 + jnp.sum(acc * acc, axis=0, keepdims=True)

    sc2, sh2 = bn_scale_shift(rsum2, rsq2, sel2_ref[...], selT2_ref[...],
                              g2_ref[...], b2_ref[...])

    # ---- stage 4: BN2 + ReLU, lane-dense full-width stores
    for n in range(N):
        out_ref[n * H:(n + 1) * H, :] = jnp.maximum(y2[n] * sc2 + sh2, 0.0)


# ------------------------------ Pallas wrapper --------------------------------

def fused_double_conv_pallas(x3d, wb1, wb2, g1, b1, g2, b2,
                             sel1, selT1, sel2, selT2,
                             *, N, H, W, Cin, Cmid, Cout, K, pad):
    kernel = functools.partial(fused_double_conv_kernel,
                               N=N, H=H, W=W, Cin=Cin, Cmid=Cmid, Cout=Cout,
                               K=K, pad=pad)
    Hp = H + 2 * pad
    return pl.pallas_call(
        kernel,
        out_shape=jax.ShapeDtypeStruct((N * H, W * Cout), jnp.float32),
        grid=(1,),
        in_specs=[
            pl.BlockSpec((N, H, W * Cin), lambda i: (0, 0, 0)),
            pl.BlockSpec((K, W * Cin, W * Cmid), lambda i: (0, 0, 0)),
            pl.BlockSpec((K, W * Cmid, W * Cout), lambda i: (0, 0, 0)),
            pl.BlockSpec((1, Cmid), lambda i: (0, 0)),
            pl.BlockSpec((1, Cmid), lambda i: (0, 0)),
            pl.BlockSpec((1, Cout), lambda i: (0, 0)),
            pl.BlockSpec((1, Cout), lambda i: (0, 0)),
            pl.BlockSpec((W * Cmid, Cmid), lambda i: (0, 0)),
            pl.BlockSpec((Cmid, W * Cmid), lambda i: (0, 0)),
            pl.BlockSpec((W * Cout, Cout), lambda i: (0, 0)),
            pl.BlockSpec((Cout, W * Cout), lambda i: (0, 0)),
        ],
        out_specs=pl.BlockSpec((N * H, W * Cout), lambda i: (0, 0)),
        scratch_shapes=[
            pltpu.VMEM((N, Hp, W * Cin), jnp.float32),
            pltpu.VMEM((N, Hp, W * Cmid), jnp.float32),
        ],
        compiler_params=pltpu.CompilerParams(
            dimension_semantics=("arbitrary",),
            vmem_limit_bytes=VMEM_LIMIT_BYTES),
    )(x3d, wb1, wb2, g1, b1, g2, b2, sel1, selT1, sel2, selT2)


def _banded_weights(w_oihw, W, pad):
    """(Cout, Cin, K, K) -> (K, W*Cin, W*Cout) banded matrices: the kx taps and
    the left/right zero padding are folded into the weight so the conv becomes
    K row-shifted matmuls with no in-kernel lane movement."""
    Cout, Cin, K, _ = w_oihw.shape
    w_hwio = jnp.transpose(w_oihw.astype(jnp.float32), (2, 3, 1, 0))  # (K,K,Ci,Co)
    wi = jnp.arange(W)[None, :, None]          # source column
    wo = jnp.arange(W)[None, None, :]          # output column
    kx = jnp.arange(K)[:, None, None]
    S = (wi == wo + kx - pad).astype(jnp.float32)          # (K, W, W)
    band = jnp.einsum('xaw,yxio->yaiwo', S, w_hwio)        # (K, W, Cin, W, Cout)
    return band.reshape(K, W * Cin, W * Cout)


@jax.jit
def double_conv_block(x_nchw, w1_oihw, g1, b1, w2_oihw, g2, b2):
    """Full forward pass. Input/output in PyTorch NCHW layout."""
    N, Cin, H, W = x_nchw.shape
    Cmid = w1_oihw.shape[0]
    Cout = w2_oihw.shape[0]
    K = w1_oihw.shape[2]
    pad = K // 2

    # NCHW -> NHWC -> lane-packed (N, H, W*Cin) view (metadata-only reshape).
    x3d = jnp.transpose(x_nchw, (0, 2, 3, 1)).astype(jnp.float32).reshape(N, H, W * Cin)

    wb1 = _banded_weights(w1_oihw, W, pad)                  # (K, W*Cin,  W*Cmid)
    wb2 = _banded_weights(w2_oihw, W, pad)                  # (K, W*Cmid, W*Cout)

    # Per-channel reduce / broadcast matrices for the lane-packed (·, W*C) layout.
    sel1 = jnp.tile(jnp.eye(Cmid, dtype=jnp.float32), (W, 1))   # (W*Cmid, Cmid)
    sel2 = jnp.tile(jnp.eye(Cout, dtype=jnp.float32), (W, 1))   # (W*Cout, Cout)

    out2d = fused_double_conv_pallas(
        x3d, wb1, wb2,
        g1.reshape(1, Cmid).astype(jnp.float32), b1.reshape(1, Cmid).astype(jnp.float32),
        g2.reshape(1, Cout).astype(jnp.float32), b2.reshape(1, Cout).astype(jnp.float32),
        sel1, sel1.T, sel2, sel2.T,
        N=N, H=H, W=W, Cin=Cin, Cmid=Cmid, Cout=Cout, K=K, pad=pad)

    out = out2d.reshape(N, H, W, Cout)
    return jnp.transpose(out, (0, 3, 1, 2))                  # -> NCHW


# ------------------------------- JAX reference --------------------------------

def reference_forward(x_nchw, w1_oihw, g1, b1, w2_oihw, g2, b2):
    def conv(x, w):
        return lax.conv_general_dilated(
            x, w, window_strides=(1, 1), padding=((1, 1), (1, 1)),
            dimension_numbers=("NCHW", "OIHW", "NCHW"))

    def bn_relu(y, g, b):
        mean = y.mean(axis=(0, 2, 3))
        var = y.var(axis=(0, 2, 3))
        yn = (y - mean[None, :, None, None]) / jnp.sqrt(var + EPS)[None, :, None, None]
        return jnp.maximum(yn * g[None, :, None, None] + b[None, :, None, None], 0.0)

    y = bn_relu(conv(x_nchw, w1_oihw), g1, b1)
    return bn_relu(conv(y, w2_oihw), g2, b2)


# ------------------------------------ main -------------------------------------

if __name__ == "__main__":
    in_channels, out_channels = 4, 8
    mid_channels = out_channels
    K = 3
    N, H, W = 2, 16, 16

    key = jax.random.PRNGKey(0)
    kx, kw1, kw2 = jax.random.split(key, 3)

    x = jax.random.normal(kx, (N, in_channels, H, W), jnp.float32)

    # Conv weights in PyTorch OIHW layout, deterministic init.
    w1_oihw = 0.1 * jax.random.normal(kw1, (mid_channels, in_channels, K, K), jnp.float32)
    w2_oihw = 0.1 * jax.random.normal(kw2, (out_channels, mid_channels, K, K), jnp.float32)
    # BatchNorm affine params: PyTorch defaults (weight=1, bias=0).
    g1 = jnp.ones((mid_channels,), jnp.float32)
    b1 = jnp.zeros((mid_channels,), jnp.float32)
    g2 = jnp.ones((out_channels,), jnp.float32)
    b2 = jnp.zeros((out_channels,), jnp.float32)

    out = double_conv_block(x, w1_oihw, g1, b1, w2_oihw, g2, b2)
    out = jax.block_until_ready(out)

    ref = reference_forward(x, w1_oihw, g1, b1, w2_oihw, g2, b2)
    assert out.shape == (N, out_channels, H, W)
    assert jnp.allclose(out, ref, atol=1e-4, rtol=1e-4), \
        f"max err {jnp.max(jnp.abs(out - ref))}"

    print("KERNEL_OK")
</pallas_src>

<mosaic_0001>
module attributes {stable_mosaic.version = 11 : i64} {
  func.func @fused_double_conv_kernel(%arg0: i32, %arg1: memref<2x16x64xf32, #tpu.memory_space<vmem>>, %arg2: memref<3x64x128xf32, #tpu.memory_space<vmem>>, %arg3: memref<3x128x128xf32, #tpu.memory_space<vmem>>, %arg4: memref<1x8xf32, #tpu.memory_space<vmem>>, %arg5: memref<1x8xf32, #tpu.memory_space<vmem>>, %arg6: memref<1x8xf32, #tpu.memory_space<vmem>>, %arg7: memref<1x8xf32, #tpu.memory_space<vmem>>, %arg8: memref<128x8xf32, #tpu.memory_space<vmem>>, %arg9: memref<8x128xf32, #tpu.memory_space<vmem>>, %arg10: memref<128x8xf32, #tpu.memory_space<vmem>>, %arg11: memref<8x128xf32, #tpu.memory_space<vmem>>, %arg12: memref<32x128xf32, #tpu.memory_space<vmem>>, %arg13: memref<2x18x64xf32, #tpu.memory_space<vmem>>, %arg14: memref<2x18x128xf32, #tpu.memory_space<vmem>>) attributes {dimension_semantics = [#tpu.dimension_semantics<arbitrary>], iteration_bounds = array<i64: 1>, scalar_prefetch = 0 : i64, scratch_operands = 2 : i64, tpu.core_type = #tpu.core_type<tc>, window_params = [{pipeline_mode = #tpu.pipeline_mode<synchronous>, transform_indices = @transform_0, window_bounds = array<i64: 2, 16, 64>}, {pipeline_mode = #tpu.pipeline_mode<synchronous>, transform_indices = @transform_1, window_bounds = array<i64: 3, 64, 128>}, {pipeline_mode = #tpu.pipeline_mode<synchronous>, transform_indices = @transform_2, window_bounds = array<i64: 3, 128, 128>}, {pipeline_mode = #tpu.pipeline_mode<synchronous>, transform_indices = @transform_3, window_bounds = array<i64: 1, 8>}, {pipeline_mode = #tpu.pipeline_mode<synchronous>, transform_indices = @transform_4, window_bounds = array<i64: 1, 8>}, {pipeline_mode = #tpu.pipeline_mode<synchronous>, transform_indices = @transform_5, window_bounds = array<i64: 1, 8>}, {pipeline_mode = #tpu.pipeline_mode<synchronous>, transform_indices = @transform_6, window_bounds = array<i64: 1, 8>}, {pipeline_mode = #tpu.pipeline_mode<synchronous>, transform_indices = @transform_7, window_bounds = array<i64: 128, 8>}, {pipeline_mode = #tpu.pipeline_mode<synchronous>, transform_indices = @transform_8, window_bounds = array<i64: 8, 128>}, {pipeline_mode = #tpu.pipeline_mode<synchronous>, transform_indices = @transform_9, window_bounds = array<i64: 128, 8>}, {pipeline_mode = #tpu.pipeline_mode<synchronous>, transform_indices = @transform_10, window_bounds = array<i64: 8, 128>}, {pipeline_mode = #tpu.pipeline_mode<synchronous>, transform_indices = @transform_11, window_bounds = array<i64: 32, 128>}]} {
    %cst = arith.constant 0.000000e+00 : f32
    %0 = vector.broadcast %cst : f32 to vector<2x1x64xf32>
    %c0 = arith.constant 0 : index
    %c0_0 = arith.constant 0 : index
    %c0_1 = arith.constant 0 : index
    %1 = vector.load %arg13[%c0, %c0_0, %c0_1] : memref<2x18x64xf32, #tpu.memory_space<vmem>>, vector<2x1x64xf32>
    tpu.vector_store %arg13[%c0, %c0_0, %c0_1], %0 {strides = array<i32>} : memref<2x18x64xf32, #tpu.memory_space<vmem>>, vector<2x1x64xf32>,
    %cst_2 = arith.constant 0.000000e+00 : f32
    %2 = vector.broadcast %cst_2 : f32 to vector<2x1x64xf32>
    %c0_3 = arith.constant 0 : index
    %c17 = arith.constant 17 : index
    %c0_4 = arith.constant 0 : index
    %3 = vector.load %arg13[%c0_3, %c17, %c0_4] : memref<2x18x64xf32, #tpu.memory_space<vmem>>, vector<2x1x64xf32>
    tpu.vector_store %arg13[%c0_3, %c17, %c0_4], %2 {strides = array<i32>} : memref<2x18x64xf32, #tpu.memory_space<vmem>>, vector<2x1x64xf32>,
    %c0_5 = arith.constant 0 : index
    %c0_6 = arith.constant 0 : index
    %c0_7 = arith.constant 0 : index
    %4 = vector.load %arg1[%c0_5, %c0_6, %c0_7] : memref<2x16x64xf32, #tpu.memory_space<vmem>>, vector<2x16x64xf32>
    %c0_8 = arith.constant 0 : index
    %c1 = arith.constant 1 : index
    %c0_9 = arith.constant 0 : index
    %5 = vector.load %arg13[%c0_8, %c1, %c0_9] : memref<2x18x64xf32, #tpu.memory_space<vmem>>, vector<2x16x64xf32>
    tpu.vector_store %arg13[%c0_8, %c1, %c0_9], %4 {strides = array<i32>} : memref<2x18x64xf32, #tpu.memory_space<vmem>>, vector<2x16x64xf32>,
    %c0_10 = arith.constant 0 : index
    %c0_11 = arith.constant 0 : index
    %c0_12 = arith.constant 0 : index
    %6 = vector.load %arg2[%c0_10, %c0_11, %c0_12] : memref<3x64x128xf32, #tpu.memory_space<vmem>>, vector<1x64x128xf32>
    %7 = vector.shape_cast %6 : vector<1x64x128xf32> to vector<64x128xf32>
    %c1_13 = arith.constant 1 : index
    %c0_14 = arith.constant 0 : index
    %c0_15 = arith.constant 0 : index
    %8 = vector.load %arg2[%c1_13, %c0_14, %c0_15] : memref<3x64x128xf32, #tpu.memory_space<vmem>>, vector<1x64x128xf32>
    %9 = vector.shape_cast %8 : vector<1x64x128xf32> to vector<64x128xf32>
    %c2 = arith.constant 2 : index
    %c0_16 = arith.constant 0 : index
    %c0_17 = arith.constant 0 : index
    %10 = vector.load %arg2[%c2, %c0_16, %c0_17] : memref<3x64x128xf32, #tpu.memory_space<vmem>>, vector<1x64x128xf32>
    %11 = vector.shape_cast %10 : vector<1x64x128xf32> to vector<64x128xf32>
    %cst_18 = arith.constant 0.000000e+00 : f32
    %12 = vector.broadcast %cst_18 : f32 to vector<1x128xf32>
    %cst_19 = arith.constant 0.000000e+00 : f32
    %13 = vector.broadcast %cst_19 : f32 to vector<1x128xf32>
    %cst_20 = arith.constant 0.000000e+00 : f32
    %14 = vector.broadcast %cst_20 : f32 to vector<16x128xf32>
    %c0_21 = arith.constant 0 : index
    %c0_22 = arith.constant 0 : index
    %c0_23 = arith.constant 0 : index
    %15 = vector.load %arg13[%c0_21, %c0_22, %c0_23] : memref<2x18x64xf32, #tpu.memory_space<vmem>>, vector<1x16x64xf32>
    %16 = vector.shape_cast %15 : vector<1x16x64xf32> to vector<16x64xf32>
    %cst_24 = arith.constant dense<0.000000e+00> : vector<16x128xf32>
    %17 = tpu.matmul %16, %7, %cst_24 {dimension_numbers = #tpu.dot_dimension_numbers<[1], [0], [0], [1], [0, 0, 1, 1], [], []>} : vector<16x64xf32>, vector<64x128xf32>, vector<16x128xf32> -> vector<16x128xf32>
    %18 = arith.addf %14, %17 : vector<16x128xf32>
    %c0_25 = arith.constant 0 : index
    %c1_26 = arith.constant 1 : index
    %c0_27 = arith.constant 0 : index
    %19 = vector.load %arg13[%c0_25, %c1_26, %c0_27] : memref<2x18x64xf32, #tpu.memory_space<vmem>>, vector<1x16x64xf32>
    %20 = vector.shape_cast %19 : vector<1x16x64xf32> to vector<16x64xf32>
    %cst_28 = arith.constant dense<0.000000e+00> : vector<16x128xf32>
    %21 = tpu.matmul %20, %9, %cst_28 {dimension_numbers = #tpu.dot_dimension_numbers<[1], [0], [0], [1], [0, 0, 1, 1], [], []>} : vector<16x64xf32>, vector<64x128xf32>, vector<16x128xf32> -> vector<16x128xf32>
    %22 = arith.addf %18, %21 : vector<16x128xf32>
    %c0_29 = arith.constant 0 : index
    %c2_30 = arith.constant 2 : index
    %c0_31 = arith.constant 0 : index
    %23 = vector.load %arg13[%c0_29, %c2_30, %c0_31] : memref<2x18x64xf32, #tpu.memory_space<vmem>>, vector<1x16x64xf32>
    %24 = vector.shape_cast %23 : vector<1x16x64xf32> to vector<16x64xf32>
    %cst_32 = arith.constant dense<0.000000e+00> : vector<16x128xf32>
    %25 = tpu.matmul %24, %11, %cst_32 {dimension_numbers = #tpu.dot_dimension_numbers<[1], [0], [0], [1], [0, 0, 1, 1], [], []>} : vector<16x64xf32>, vector<64x128xf32>, vector<16x128xf32> -> vector<16x128xf32>
    %26 = arith.addf %22, %25 : vector<16x128xf32>
    %cst_33 = arith.constant dense<0.000000e+00> : vector<128xf32>
    %27 = vector.multi_reduction <add>, %26, %cst_33 [0] : vector<16x128xf32> to vector<128xf32>
    %28 = vector.shape_cast %27 : vector<128xf32> to vector<1x128xf32>
    %29 = arith.addf %12, %28 : vector<1x128xf32>
    %30 = arith.mulf %26, %26 : vector<16x128xf32>
    %cst_34 = arith.constant dense<0.000000e+00> : vector<128xf32>
    %31 = vector.multi_reduction <add>, %30, %cst_34 [0] : vector<16x128xf32> to vector<128xf32>
    %32 = vector.shape_cast %31 : vector<128xf32> to vector<1x128xf32>
    %33 = arith.addf %13, %32 : vector<1x128xf32>
    %cst_35 = arith.constant 0.000000e+00 : f32
    %34 = vector.broadcast %cst_35 : f32 to vector<16x128xf32>
    %c1_36 = arith.constant 1 : index
    %c0_37 = arith.constant 0 : index
    %c0_38 = arith.constant 0 : index
    %35 = vector.load %arg13[%c1_36, %c0_37, %c0_38] : memref<2x18x64xf32, #tpu.memory_space<vmem>>, vector<1x16x64xf32>
    %36 = vector.shape_cast %35 : vector<1x16x64xf32> to vector<16x64xf32>
    %cst_39 = arith.constant dense<0.000000e+00> : vector<16x128xf32>
    %37 = tpu.matmul %36, %7, %cst_39 {dimension_numbers = #tpu.dot_dimension_numbers<[1], [0], [0], [1], [0, 0, 1, 1], [], []>} : vector<16x64xf32>, vector<64x128xf32>, vector<16x128xf32> -> vector<16x128xf32>
    %38 = arith.addf %34, %37 : vector<16x128xf32>
    %c1_40 = arith.constant 1 : index
    %c1_41 = arith.constant 1 : index
    %c0_42 = arith.constant 0 : index
    %39 = vector.load %arg13[%c1_40, %c1_41, %c0_42] : memref<2x18x64xf32, #tpu.memory_space<vmem>>, vector<1x16x64xf32>
    %40 = vector.shape_cast %39 : vector<1x16x64xf32> to vector<16x64xf32>
    %cst_43 = arith.constant dense<0.000000e+00> : vector<16x128xf32>
    %41 = tpu.matmul %40, %9, %cst_43 {dimension_numbers = #tpu.dot_dimension_numbers<[1], [0], [0], [1], [0, 0, 1, 1], [], []>} : vector<16x64xf32>, vector<64x128xf32>, vector<16x128xf32> -> vector<16x128xf32>
    %42 = arith.addf %38, %41 : vector<16x128xf32>
    %c1_44 = arith.constant 1 : index
    %c2_45 = arith.constant 2 : index
    %c0_46 = arith.constant 0 : index
    %43 = vector.load %arg13[%c1_44, %c2_45, %c0_46] : memref<2x18x64xf32, #tpu.memory_space<vmem>>, vector<1x16x64xf32>
    %44 = vector.shape_cast %43 : vector<1x16x64xf32> to vector<16x64xf32>
    %cst_47 = arith.constant dense<0.000000e+00> : vector<16x128xf32>
    %45 = tpu.matmul %44, %11, %cst_47 {dimension_numbers = #tpu.dot_dimension_numbers<[1], [0], [0], [1], [0, 0, 1, 1], [], []>} : vector<16x64xf32>, vector<64x128xf32>, vector<16x128xf32> -> vector<16x128xf32>
    %46 = arith.addf %42, %45 : vector<16x128xf32>
    %cst_48 = arith.constant dense<0.000000e+00> : vector<128xf32>
    %47 = vector.multi_reduction <add>, %46, %cst_48 [0] : vector<16x128xf32> to vector<128xf32>
    %48 = vector.shape_cast %47 : vector<128xf32> to vector<1x128xf32>
    %49 = arith.addf %29, %48 : vector<1x128xf32>
    %50 = arith.mulf %46, %46 : vector<16x128xf32>
    %cst_49 = arith.constant dense<0.000000e+00> : vector<128xf32>
    %51 = vector.multi_reduction <add>, %50, %cst_49 [0] : vector<16x128xf32> to vector<128xf32>
    %52 = vector.shape_cast %51 : vector<128xf32> to vector<1x128xf32>
    %53 = arith.addf %33, %52 : vector<1x128xf32>
    %c0_50 = arith.constant 0 : index
    %c0_51 = arith.constant 0 : index
    %54 = vector.load %arg8[%c0_50, %c0_51] : memref<128x8xf32, #tpu.memory_space<vmem>>, vector<128x8xf32>
    %c0_52 = arith.constant 0 : index
    %c0_53 = arith.constant 0 : index
    %55 = vector.load %arg9[%c0_52, %c0_53] : memref<8x128xf32, #tpu.memory_space<vmem>>, vector<8x128xf32>
    %c0_54 = arith.constant 0 : index
    %c0_55 = arith.constant 0 : index
    %56 = vector.load %arg4[%c0_54, %c0_55] : memref<1x8xf32, #tpu.memory_space<vmem>>, vector<1x8xf32>
    %c0_56 = arith.constant 0 : index
    %c0_57 = arith.constant 0 : index
    %57 = vector.load %arg5[%c0_56, %c0_57] : memref<1x8xf32, #tpu.memory_space<vmem>>, vector<1x8xf32>
    %cst_58 = arith.constant dense<0.000000e+00> : vector<1x8xf32>
    %58 = tpu.matmul %49, %54, %cst_58 {dimension_numbers = #tpu.dot_dimension_numbers<[1], [0], [0], [1], [0, 0, 1, 1], [], []>} : vector<1x128xf32>, vector<128x8xf32>, vector<1x8xf32> -> vector<1x8xf32>
    %cst_59 = arith.constant dense<0.000000e+00> : vector<1x8xf32>
    %59 = tpu.matmul %53, %54, %cst_59 {dimension_numbers = #tpu.dot_dimension_numbers<[1], [0], [0], [1], [0, 0, 1, 1], [], []>} : vector<1x128xf32>, vector<128x8xf32>, vector<1x8xf32> -> vector<1x8xf32>
    %cst_60 = arith.constant 0.001953125 : f32
    %60 = vector.broadcast %cst_60 : f32 to vector<1x8xf32>
    %61 = arith.mulf %58, %60 : vector<1x8xf32>
    %cst_61 = arith.constant 0.001953125 : f32
    %62 = vector.broadcast %cst_61 : f32 to vector<1x8xf32>
    %63 = arith.mulf %59, %62 : vector<1x8xf32>
    %64 = arith.mulf %61, %61 : vector<1x8xf32>
    %65 = arith.subf %63, %64 : vector<1x8xf32>
    %cst_62 = arith.constant 0.000000e+00 : f32
    %66 = vector.broadcast %cst_62 : f32 to vector<1x8xf32>
    %67 = arith.maximumf %65, %66 : vector<1x8xf32>
    %cst_63 = arith.constant 9.99999974E-6 : f32
    %68 = vector.broadcast %cst_63 : f32 to vector<1x8xf32>
    %69 = arith.addf %67, %68 : vector<1x8xf32>
    %70 = math.sqrt %69 : vector<1x8xf32>
    %71 = arith.divf %56, %70 : vector<1x8xf32>
    %72 = arith.mulf %61, %71 : vector<1x8xf32>
    %73 = arith.subf %57, %72 : vector<1x8xf32>
    %cst_64 = arith.constant dense<0.000000e+00> : vector<1x128xf32>
    %74 = tpu.matmul %71, %55, %cst_64 {dimension_numbers = #tpu.dot_dimension_numbers<[1], [0], [0], [1], [0, 0, 1, 1], [], []>} : vector<1x8xf32>, vector<8x128xf32>, vector<1x128xf32> -> vector<1x128xf32>
    %cst_65 = arith.constant dense<0.000000e+00> : vector<1x128xf32>
    %75 = tpu.matmul %73, %55, %cst_65 {dimension_numbers = #tpu.dot_dimension_numbers<[1], [0], [0], [1], [0, 0, 1, 1], [], []>} : vector<1x8xf32>, vector<8x128xf32>, vector<1x128xf32> -> vector<1x128xf32>
    %cst_66 = arith.constant 0.000000e+00 : f32
    %76 = vector.broadcast %cst_66 : f32 to vector<2x1x128xf32>
    %c0_67 = arith.constant 0 : index
    %c0_68 = arith.constant 0 : index
    %c0_69 = arith.constant 0 : index
    %77 = vector.load %arg14[%c0_67, %c0_68, %c0_69] : memref<2x18x128xf32, #tpu.memory_space<vmem>>, vector<2x1x128xf32>
    tpu.vector_store %arg14[%c0_67, %c0_68, %c0_69], %76 {strides = array<i32>} : memref<2x18x128xf32, #tpu.memory_space<vmem>>, vector<2x1x128xf32>,
    %cst_70 = arith.constant 0.000000e+00 : f32
    %78 = vector.broadcast %cst_70 : f32 to vector<2x1x128xf32>
    %c0_71 = arith.constant 0 : index
    %c17_72 = arith.constant 17 : index
    %c0_73 = arith.constant 0 : index
    %79 = vector.load %arg14[%c0_71, %c17_72, %c0_73] : memref<2x18x128xf32, #tpu.memory_space<vmem>>, vector<2x1x128xf32>
    tpu.vector_store %arg14[%c0_71, %c17_72, %c0_73], %78 {strides = array<i32>} : memref<2x18x128xf32, #tpu.memory_space<vmem>>, vector<2x1x128xf32>,
    %80 = vector.broadcast %74 : vector<1x128xf32> to vector<16x128xf32>
    %81 = arith.mulf %26, %80 : vector<16x128xf32>
    %82 = vector.broadcast %75 : vector<1x128xf32> to vector<16x128xf32>
    %83 = arith.addf %81, %82 : vector<16x128xf32>
    %cst_74 = arith.constant 0.000000e+00 : f32
    %84 = vector.broadcast %cst_74 : f32 to vector<16x128xf32>
    %85 = arith.maximumf %83, %84 : vector<16x128xf32>
    %c0_75 = arith.constant 0 : index
    %c1_76 = arith.constant 1 : index
    %c0_77 = arith.constant 0 : index
    %86 = vector.load %arg14[%c0_75, %c1_76, %c0_77] : memref<2x18x128xf32, #tpu.memory_space<vmem>>, vector<1x16x128xf32>
    %87 = vector.shape_cast %86 : vector<1x16x128xf32> to vector<16x128xf32>
    %88 = vector.shape_cast %85 : vector<16x128xf32> to vector<1x16x128xf32>
    tpu.vector_store %arg14[%c0_75, %c1_76, %c0_77], %88 {strides = array<i32>} : memref<2x18x128xf32, #tpu.memory_space<vmem>>, vector<1x16x128xf32>,
    %89 = vector.broadcast %74 : vector<1x128xf32> to vector<16x128xf32>
    %90 = arith.mulf %46, %89 : vector<16x128xf32>
    %91 = vector.broadcast %75 : vector<1x128xf32> to vector<16x128xf32>
    %92 = arith.addf %90, %91 : vector<16x128xf32>
    %cst_78 = arith.constant 0.000000e+00 : f32
    %93 = vector.broadcast %cst_78 : f32 to vector<16x128xf32>
    %94 = arith.maximumf %92, %93 : vector<16x128xf32>
    %c1_79 = arith.constant 1 : index
    %c1_80 = arith.constant 1 : index
    %c0_81 = arith.constant 0 : index
    %95 = vector.load %arg14[%c1_79, %c1_80, %c0_81] : memref<2x18x128xf32, #tpu.memory_space<vmem>>, vector<1x16x128xf32>
    %96 = vector.shape_cast %95 : vector<1x16x128xf32> to vector<16x128xf32>
    %97 = vector.shape_cast %94 : vector<16x128xf32> to vector<1x16x128xf32>
    tpu.vector_store %arg14[%c1_79, %c1_80, %c0_81], %97 {strides = array<i32>} : memref<2x18x128xf32, #tpu.memory_space<vmem>>, vector<1x16x128xf32>,
    %c0_82 = arith.constant 0 : index
    %c0_83 = arith.constant 0 : index
    %c0_84 = arith.constant 0 : index
    %98 = vector.load %arg3[%c0_82, %c0_83, %c0_84] : memref<3x128x128xf32, #tpu.memory_space<vmem>>, vector<1x128x128xf32>
    %99 = vector.shape_cast %98 : vector<1x128x128xf32> to vector<128x128xf32>
    %c1_85 = arith.constant 1 : index
    %c0_86 = arith.constant 0 : index
    %c0_87 = arith.constant 0 : index
    %100 = vector.load %arg3[%c1_85, %c0_86, %c0_87] : memref<3x128x128xf32, #tpu.memory_space<vmem>>, vector<1x128x128xf32>
    %101 = vector.shape_cast %100 : vector<1x128x128xf32> to vector<128x128xf32>
    %c2_88 = arith.constant 2 : index
    %c0_89 = arith.constant 0 : index
    %c0_90 = arith.constant 0 : index
    %102 = vector.load %arg3[%c2_88, %c0_89, %c0_90] : memref<3x128x128xf32, #tpu.memory_space<vmem>>, vector<1x128x128xf32>
    %103 = vector.shape_cast %102 : vector<1x128x128xf32> to vector<128x128xf32>
    %cst_91 = arith.constant 0.000000e+00 : f32
    %104 = vector.broadcast %cst_91 : f32 to vector<1x128xf32>
    %cst_92 = arith.constant 0.000000e+00 : f32
    %105 = vector.broadcast %cst_92 : f32 to vector<1x128xf32>
    %cst_93 = arith.constant 0.000000e+00 : f32
    %106 = vector.broadcast %cst_93 : f32 to vector<16x128xf32>
    %c0_94 = arith.constant 0 : index
    %c0_95 = arith.constant 0 : index
    %c0_96 = arith.constant 0 : index
    %107 = vector.load %arg14[%c0_94, %c0_95, %c0_96] : memref<2x18x128xf32, #tpu.memory_space<vmem>>, vector<1x16x128xf32>
    %108 = vector.shape_cast %107 : vector<1x16x128xf32> to vector<16x128xf32>
    %cst_97 = arith.constant dense<0.000000e+00> : vector<16x128xf32>
    %109 = tpu.matmul %108, %99, %cst_97 {dimension_numbers = #tpu.dot_dimension_numbers<[1], [0], [0], [1], [0, 0, 1, 1], [], []>} : vector<16x128xf32>, vector<128x128xf32>, vector<16x128xf32> -> vector<16x128xf32>
    %110 = arith.addf %106, %109 : vector<16x128xf32>
    %c0_98 = arith.constant 0 : index
    %c1_99 = arith.constant 1 : index
    %c0_100 = arith.constant 0 : index
    %111 = vector.load %arg14[%c0_98, %c1_99, %c0_100] : memref<2x18x128xf32, #tpu.memory_space<vmem>>, vector<1x16x128xf32>
    %112 = vector.shape_cast %111 : vector<1x16x128xf32> to vector<16x128xf32>
    %cst_101 = arith.constant dense<0.000000e+00> : vector<16x128xf32>
    %113 = tpu.matmul %112, %101, %cst_101 {dimension_numbers = #tpu.dot_dimension_numbers<[1], [0], [0], [1], [0, 0, 1, 1], [], []>} : vector<16x128xf32>, vector<128x128xf32>, vector<16x128xf32> -> vector<16x128xf32>
    %114 = arith.addf %110, %113 : vector<16x128xf32>
    %c0_102 = arith.constant 0 : index
    %c2_103 = arith.constant 2 : index
    %c0_104 = arith.constant 0 : index
    %115 = vector.load %arg14[%c0_102, %c2_103, %c0_104] : memref<2x18x128xf32, #tpu.memory_space<vmem>>, vector<1x16x128xf32>
    %116 = vector.shape_cast %115 : vector<1x16x128xf32> to vector<16x128xf32>
    %cst_105 = arith.constant dense<0.000000e+00> : vector<16x128xf32>
    %117 = tpu.matmul %116, %103, %cst_105 {dimension_numbers = #tpu.dot_dimension_numbers<[1], [0], [0], [1], [0, 0, 1, 1], [], []>} : vector<16x128xf32>, vector<128x128xf32>, vector<16x128xf32> -> vector<16x128xf32>
    %118 = arith.addf %114, %117 : vector<16x128xf32>
    %cst_106 = arith.constant dense<0.000000e+00> : vector<128xf32>
    %119 = vector.multi_reduction <add>, %118, %cst_106 [0] : vector<16x128xf32> to vector<128xf32>
    %120 = vector.shape_cast %119 : vector<128xf32> to vector<1x128xf32>
    %121 = arith.addf %104, %120 : vector<1x128xf32>
    %122 = arith.mulf %118, %118 : vector<16x128xf32>
    %cst_107 = arith.constant dense<0.000000e+00> : vector<128xf32>
    %123 = vector.multi_reduction <add>, %122, %cst_107 [0] : vector<16x128xf32> to vector<128xf32>
    %124 = vector.shape_cast %123 : vector<128xf32> to vector<1x128xf32>
    %125 = arith.addf %105, %124 : vector<1x128xf32>
    %cst_108 = arith.constant 0.000000e+00 : f32
    %126 = vector.broadcast %cst_108 : f32 to vector<16x128xf32>
    %c1_109 = arith.constant 1 : index
    %c0_110 = arith.constant 0 : index
    %c0_111 = arith.constant 0 : index
    %127 = vector.load %arg14[%c1_109, %c0_110, %c0_111] : memref<2x18x128xf32, #tpu.memory_space<vmem>>, vector<1x16x128xf32>
    %128 = vector.shape_cast %127 : vector<1x16x128xf32> to vector<16x128xf32>
    %cst_112 = arith.constant dense<0.000000e+00> : vector<16x128xf32>
    %129 = tpu.matmul %128, %99, %cst_112 {dimension_numbers = #tpu.dot_dimension_numbers<[1], [0], [0], [1], [0, 0, 1, 1], [], []>} : vector<16x128xf32>, vector<128x128xf32>, vector<16x128xf32> -> vector<16x128xf32>
    %130 = arith.addf %126, %129 : vector<16x128xf32>
    %c1_113 = arith.constant 1 : index
    %c1_114 = arith.constant 1 : index
    %c0_115 = arith.constant 0 : index
    %131 = vector.load %arg14[%c1_113, %c1_114, %c0_115] : memref<2x18x128xf32, #tpu.memory_space<vmem>>, vector<1x16x128xf32>
    %132 = vector.shape_cast %131 : vector<1x16x128xf32> to vector<16x128xf32>
    %cst_116 = arith.constant dense<0.000000e+00> : vector<16x128xf32>
    %133 = tpu.matmul %132, %101, %cst_116 {dimension_numbers = #tpu.dot_dimension_numbers<[1], [0], [0], [1], [0, 0, 1, 1], [], []>} : vector<16x128xf32>, vector<128x128xf32>, vector<16x128xf32> -> vector<16x128xf32>
    %134 = arith.addf %130, %133 : vector<16x128xf32>
    %c1_117 = arith.constant 1 : index
    %c2_118 = arith.constant 2 : index
    %c0_119 = arith.constant 0 : index
    %135 = vector.load %arg14[%c1_117, %c2_118, %c0_119] : memref<2x18x128xf32, #tpu.memory_space<vmem>>, vector<1x16x128xf32>
    %136 = vector.shape_cast %135 : vector<1x16x128xf32> to vector<16x128xf32>
    %cst_120 = arith.constant dense<0.000000e+00> : vector<16x128xf32>
    %137 = tpu.matmul %136, %103, %cst_120 {dimension_numbers = #tpu.dot_dimension_numbers<[1], [0], [0], [1], [0, 0, 1, 1], [], []>} : vector<16x128xf32>, vector<128x128xf32>, vector<16x128xf32> -> vector<16x128xf32>
    %138 = arith.addf %134, %137 : vector<16x128xf32>
    %cst_121 = arith.constant dense<0.000000e+00> : vector<128xf32>
    %139 = vector.multi_reduction <add>, %138, %cst_121 [0] : vector<16x128xf32> to vector<128xf32>
    %140 = vector.shape_cast %139 : vector<128xf32> to vector<1x128xf32>
    %141 = arith.addf %121, %140 : vector<1x128xf32>
    %142 = arith.mulf %138, %138 : vector<16x128xf32>
    %cst_122 = arith.constant dense<0.000000e+00> : vector<128xf32>
    %143 = vector.multi_reduction <add>, %142, %cst_122 [0] : vector<16x128xf32> to vector<128xf32>
    %144 = vector.shape_cast %143 : vector<128xf32> to vector<1x128xf32>
    %145 = arith.addf %125, %144 : vector<1x128xf32>
    %c0_123 = arith.constant 0 : index
    %c0_124 = arith.constant 0 : index
    %146 = vector.load %arg10[%c0_123, %c0_124] : memref<128x8xf32, #tpu.memory_space<vmem>>, vector<128x8xf32>
    %c0_125 = arith.constant 0 : index
    %c0_126 = arith.constant 0 : index
    %147 = vector.load %arg11[%c0_125, %c0_126] : memref<8x128xf32, #tpu.memory_space<vmem>>, vector<8x128xf32>
    %c0_127 = arith.constant 0 : index
    %c0_128 = arith.constant 0 : index
    %148 = vector.load %arg6[%c0_127, %c0_128] : memref<1x8xf32, #tpu.memory_space<vmem>>, vector<1x8xf32>
    %c0_129 = arith.constant 0 : index
    %c0_130 = arith.constant 0 : index
    %149 = vector.load %arg7[%c0_129, %c0_130] : memref<1x8xf32, #tpu.memory_space<vmem>>, vector<1x8xf32>
    %cst_131 = arith.constant dense<0.000000e+00> : vector<1x8xf32>
    %150 = tpu.matmul %141, %146, %cst_131 {dimension_numbers = #tpu.dot_dimension_numbers<[1], [0], [0], [1], [0, 0, 1, 1], [], []>} : vector<1x128xf32>, vector<128x8xf32>, vector<1x8xf32> -> vector<1x8xf32>
    %cst_132 = arith.constant dense<0.000000e+00> : vector<1x8xf32>
    %151 = tpu.matmul %145, %146, %cst_132 {dimension_numbers = #tpu.dot_dimension_numbers<[1], [0], [0], [1], [0, 0, 1, 1], [], []>} : vector<1x128xf32>, vector<128x8xf32>, vector<1x8xf32> -> vector<1x8xf32>
    %cst_133 = arith.constant 0.001953125 : f32
    %152 = vector.broadcast %cst_133 : f32 to vector<1x8xf32>
    %153 = arith.mulf %150, %152 : vector<1x8xf32>
    %cst_134 = arith.constant 0.001953125 : f32
    %154 = vector.broadcast %cst_134 : f32 to vector<1x8xf32>
    %155 = arith.mulf %151, %154 : vector<1x8xf32>
    %156 = arith.mulf %153, %153 : vector<1x8xf32>
    %157 = arith.subf %155, %156 : vector<1x8xf32>
    %cst_135 = arith.constant 0.000000e+00 : f32
    %158 = vector.broadcast %cst_135 : f32 to vector<1x8xf32>
    %159 = arith.maximumf %157, %158 : vector<1x8xf32>
    %cst_136 = arith.constant 9.99999974E-6 : f32
    %160 = vector.broadcast %cst_136 : f32 to vector<1x8xf32>
    %161 = arith.addf %159, %160 : vector<1x8xf32>
    %162 = math.sqrt %161 : vector<1x8xf32>
    %163 = arith.divf %148, %162 : vector<1x8xf32>
    %164 = arith.mulf %153, %163 : vector<1x8xf32>
    %165 = arith.subf %149, %164 : vector<1x8xf32>
    %cst_137 = arith.constant dense<0.000000e+00> : vector<1x128xf32>
    %166 = tpu.matmul %163, %147, %cst_137 {dimension_numbers = #tpu.dot_dimension_numbers<[1], [0], [0], [1], [0, 0, 1, 1], [], []>} : vector<1x8xf32>, vector<8x128xf32>, vector<1x128xf32> -> vector<1x128xf32>
    %cst_138 = arith.constant dense<0.000000e+00> : vector<1x128xf32>
    %167 = tpu.matmul %165, %147, %cst_138 {dimension_numbers = #tpu.dot_dimension_numbers<[1], [0], [0], [1], [0, 0, 1, 1], [], []>} : vector<1x8xf32>, vector<8x128xf32>, vector<1x128xf32> -> vector<1x128xf32>
    %168 = vector.broadcast %166 : vector<1x128xf32> to vector<16x128xf32>
    %169 = arith.mulf %118, %168 : vector<16x128xf32>
    %170 = vector.broadcast %167 : vector<1x128xf32> to vector<16x128xf32>
    %171 = arith.addf %169, %170 : vector<16x128xf32>
    %cst_139 = arith.constant 0.000000e+00 : f32
    %172 = vector.broadcast %cst_139 : f32 to vector<16x128xf32>
    %173 = arith.maximumf %171, %172 : vector<16x128xf32>
    %c0_140 = arith.constant 0 : index
    %c0_141 = arith.constant 0 : index
    %174 = vector.load %arg12[%c0_140, %c0_141] : memref<32x128xf32, #tpu.memory_space<vmem>>, vector<16x128xf32>
    tpu.vector_store %arg12[%c0_140, %c0_141], %173 {strides = array<i32>} : memref<32x128xf32, #tpu.memory_space<vmem>>, vector<16x128xf32>,
    %175 = vector.broadcast %166 : vector<1x128xf32> to vector<16x128xf32>
    %176 = arith.mulf %138, %175 : vector<16x128xf32>
    %177 = vector.broadcast %167 : vector<1x128xf32> to vector<16x128xf32>
    %178 = arith.addf %176, %177 : vector<16x128xf32>
    %cst_142 = arith.constant 0.000000e+00 : f32
    %179 = vector.broadcast %cst_142 : f32 to vector<16x128xf32>
    %180 = arith.maximumf %178, %179 : vector<16x128xf32>
    %c16 = arith.constant 16 : index
    %c0_143 = arith.constant 0 : index
    %181 = vector.load %arg12[%c16, %c0_143] : memref<32x128xf32, #tpu.memory_space<vmem>>, vector<16x128xf32>
    tpu.vector_store %arg12[%c16, %c0_143], %180 {strides = array<i32>} : memref<32x128xf32, #tpu.memory_space<vmem>>, vector<16x128xf32>,
    return
  }
  func.func @transform_0(%arg0: i32) -> (i32, i32, i32) {
    %c0_i32 = arith.constant 0 : i32
    %c0_i32_0 = arith.constant 0 : i32
    %c0_i32_1 = arith.constant 0 : i32
    %c0_i32_2 = arith.constant 0 : i32
    return %c0_i32, %c0_i32_0, %c0_i32_1 : i32, i32, i32
  }
  func.func @transform_1(%arg0: i32) -> (i32, i32, i32) {
    %c0_i32 = arith.constant 0 : i32
    %c0_i32_0 = arith.constant 0 : i32
    %c0_i32_1 = arith.constant 0 : i32
    %c0_i32_2 = arith.constant 0 : i32
    return %c0_i32, %c0_i32_0, %c0_i32_1 : i32, i32, i32
  }
  func.func @transform_2(%arg0: i32) -> (i32, i32, i32) {
    %c0_i32 = arith.constant 0 : i32
    %c0_i32_0 = arith.constant 0 : i32
    %c0_i32_1 = arith.constant 0 : i32
    %c0_i32_2 = arith.constant 0 : i32
    return %c0_i32, %c0_i32_0, %c0_i32_1 : i32, i32, i32
  }
  func.func @transform_3(%arg0: i32) -> (i32, i32) {
    %c0_i32 = arith.constant 0 : i32
    %c0_i32_0 = arith.constant 0 : i32
    %c0_i32_1 = arith.constant 0 : i32
    return %c0_i32, %c0_i32_0 : i32, i32
  }
  func.func @transform_4(%arg0: i32) -> (i32, i32) {
    %c0_i32 = arith.constant 0 : i32
    %c0_i32_0 = arith.constant 0 : i32
    %c0_i32_1 = arith.constant 0 : i32
    return %c0_i32, %c0_i32_0 : i32, i32
  }
  func.func @transform_5(%arg0: i32) -> (i32, i32) {
    %c0_i32 = arith.constant 0 : i32
    %c0_i32_0 = arith.constant 0 : i32
    %c0_i32_1 = arith.constant 0 : i32
    return %c0_i32, %c0_i32_0 : i32, i32
  }
  func.func @transform_6(%arg0: i32) -> (i32, i32) {
    %c0_i32 = arith.constant 0 : i32
    %c0_i32_0 = arith.constant 0 : i32
    %c0_i32_1 = arith.constant 0 : i32
    return %c0_i32, %c0_i32_0 : i32, i32
  }
  func.func @transform_7(%arg0: i32) -> (i32, i32) {
    %c0_i32 = arith.constant 0 : i32
    %c0_i32_0 = arith.constant 0 : i32
    %c0_i32_1 = arith.constant 0 : i32
    return %c0_i32, %c0_i32_0 : i32, i32
  }
  func.func @transform_8(%arg0: i32) -> (i32, i32) {
    %c0_i32 = arith.constant 0 : i32
    %c0_i32_0 = arith.constant 0 : i32
    %c0_i32_1 = arith.constant 0 : i32
    return %c0_i32, %c0_i32_0 : i32, i32
  }
  func.func @transform_9(%arg0: i32) -> (i32, i32) {
    %c0_i32 = arith.constant 0 : i32
    %c0_i32_0 = arith.constant 0 : i32
    %c0_i32_1 = arith.constant 0 : i32
    return %c0_i32, %c0_i32_0 : i32, i32
  }
  func.func @transform_10(%arg0: i32) -> (i32, i32) {
    %c0_i32 = arith.constant 0 : i32
    %c0_i32_0 = arith.constant 0 : i32
    %c0_i32_1 = arith.constant 0 : i32
    return %c0_i32, %c0_i32_0 : i32, i32
  }
  func.func @transform_11(%arg0: i32) -> (i32, i32) {
    %c0_i32 = arith.constant 0 : i32
    %c0_i32_0 = arith.constant 0 : i32
    %c0_i32_1 = arith.constant 0 : i32
    return %c0_i32, %c0_i32_0 : i32, i32
  }
}

</mosaic_0001>

<bundles_post_ra>
// kernel: tile.14
= control target key start
LH: loop header
LB: loop body
LE: loop exit
PB: predicated region body
PF: predicated region fallthrough
CT: control target
= control target key end

     0   :  { %vm6_vm0 = vcmask 1043458   ;;  %vm10_vm1 = vcmask 1045508   ;;  %vm14_vm2 = vcmask 1047558   ;;  %s19_s6 = smov 3  ;;  %s22_s7 = smov 12  ;;  %vm16_vm3 = vcmask 64512   ;;  %s736_s0 = inlined_call_operand.vmem [shape: f32[16,8,8], index: 0, kind: input, shape index: {}]   ;;  %s737_s1 = inlined_call_operand.vmem [shape: f32[128,8], index: 1, kind: output, shape index: {}]  }
   0x1   :  { %v348_v0 = vld [vmem:[%s736_s0 + $0xf] ss:$16 sm:%s19_s6]   ;;  %s27_s12 = smov 48  ;;  %s32_s13 = smov 192  ;;  %vm38_vm4 = vcmask 1048512   ;;  %vm60_vm5 = vcmask 982912  }
   0x2   :  { %v349_v1 = vld [vmem:[%s736_s0 + $0xf] ss:$16 sm:%s22_s7]   ;;  %s63_s18 = smov 3  ;;  %s66_s21 = smov 12  ;;  %vm82_vm6 = vcmask 917312   ;;  %vm104_vm7 = vcmask 851712  }
   0x3   :  { %v25_v2 = vsel %vm6_vm0, %v349_v1, %v348_v0  ;;  %v350_v3 = vld [vmem:[%s736_s0 + $0xf] ss:$16 sm:%s27_s12]   ;;  %v356_v6 = vld [vmem:[%s736_s0 + $0xd] ss:$16 sm:%s63_s18]   ;;  %s71_s22 = smov 48  ;;  %s76_s27 = smov 192 }
   0x4   :  { %v351_v4 = vld [vmem:[%s736_s0 + $0xf] ss:$16 sm:%s32_s13]   ;;  %v30_v5 = vsel %vm10_vm1, %v350_v3, %v25_v2  ;;  %v357_v8 = vld [vmem:[%s736_s0 + $0xd] ss:$16 sm:%s66_s21]   ;;  %s423_s28 = smov 120   ;;  %s41_s2 = smov 3 }
   0x5   :  { %v35_v7 = vsel %vm14_vm2, %v351_v4, %v30_v5  ;;  %v358_v9 = vld [vmem:[%s736_s0 + $0xd] ss:$16 sm:%s71_s22]   ;;  %v69_v10 = vsel %vm6_vm0, %v357_v8, %v356_v6  ;;  %s44_s3 = smov 12  ;;  %v352_v13 = vld [vmem:[%s736_s0 + $0xe] ss:$16 sm:%s41_s2]   ;;  %s49_s8 = smov 48 }
   0x6   :  { %36 = vrot.lane.b32.xlu0 %v35_v7, %s423_s28  ;;  %v359_v11 = vld [vmem:[%s736_s0 + $0xd] ss:$16 sm:%s76_s27]   ;;  %v74_v12 = vsel %vm10_vm1, %v358_v9, %v69_v10  ;;  %s54_s9 = smov 192  ;;  %s85_s14 = smov 3  ;;  %vm126_vm8 = vcmask 786112   ;;  %vm148_vm9 = vcmask 720512  }
   0x7   :  { %v353_v14 = vld [vmem:[%s736_s0 + $0xe] ss:$16 sm:%s44_s3]   ;;  %v79_v15 = vsel %vm14_vm2, %v359_v11, %v74_v12  ;;  %s424_s15 = smov 104   ;;  %v360_v20 = vld [vmem:[%s736_s0 + $0xc] ss:$16 sm:%s85_s14]   ;;  %s88_s18 = smov 12 }
   0x8   :  { %v47_v16 = vsel %vm6_vm0, %v353_v14, %v352_v13  ;;  %v354_v17 = vld [vmem:[%s736_s0 + $0xe] ss:$16 sm:%s49_s8]   ;;  %80 = vrot.lane.b32.xlu1 %v79_v15, %s424_s15  ;;  %s93_s19 = smov 48  ;;  %s98_s24 = smov 192  ;;  %vm170_vm10 = vcmask 654912   ;;  %vm192_vm11 = vcmask 589312  }
   0x9   :  { %v355_v18 = vld [vmem:[%s736_s0 + $0xe] ss:$16 sm:%s54_s9]   ;;  %v52_v19 = vsel %vm10_vm1, %v354_v17, %v47_v16  ;;  %v361_v22 = vld [vmem:[%s736_s0 + $0xc] ss:$16 sm:%s88_s18]   ;;  %s425_s25 = smov 112   ;;  %s107_s28 = smov 3 }
   0xa   :  { %v57_v21 = vsel %vm14_vm2, %v355_v18, %v52_v19  ;;  %v362_v23 = vld [vmem:[%s736_s0 + $0xc] ss:$16 sm:%s93_s19]   ;;  %v91_v24 = vsel %vm6_vm0, %v361_v22, %v360_v20  ;;  %s110_s29 = smov 12  ;;  %v364_v27 = vld [vmem:[%s736_s0 + $0xb] ss:$16 sm:%s107_s28]   ;;  %s115_s5 = smov 48 }
   0xb   :  { %58 = vrot.lane.b32.xlu0 %v57_v21, %s425_s25  ;;  %v363_v25 = vld [vmem:[%s736_s0 + $0xc] ss:$16 sm:%s98_s24]   ;;  %v96_v26 = vsel %vm10_vm1, %v362_v23, %v91_v24  ;;  %s120_s6 = smov 192  ;;  %s129_s11 = smov 3  ;;  %vm214_vm12 = vcmask 523712   ;;  %vm236_vm13 = vcmask 458112  }
   0xc   :  { %v365_v28 = vld [vmem:[%s736_s0 + $0xb] ss:$16 sm:%s110_s29]   ;;  %v101_v29 = vsel %vm14_vm2, %v363_v25, %v96_v26  ;;  %s426_s12 = smov 96   ;;  %v368_v34 = vld [vmem:[%s736_s0 + $0xa] ss:$16 sm:%s129_s11]   ;;  %s132_s15 = smov 12 }
   0xd   :  { %v113_v30 = vsel %vm6_vm0, %v365_v28, %v364_v27  ;;  %v366_v31 = vld [vmem:[%s736_s0 + $0xb] ss:$16 sm:%s115_s5]   ;;  %102 = vrot.lane.b32.xlu1 %v101_v29, %s426_s12  ;;  %s137_s16 = smov 48  ;;  %s142_s21 = smov 192  ;;  %vm258_vm14 = vcmask 392512   ;;  %vm280_vm15 = vcmask 326912  }
   0xe   :  { %v367_v32 = vld [vmem:[%s736_s0 + $0xb] ss:$16 sm:%s120_s6]   ;;  %v118_v33 = vsel %vm10_vm1, %v366_v31, %v113_v30  ;;  %v369_v36 = vld [vmem:[%s736_s0 + $0xa] ss:$16 sm:%s132_s15]   ;;  %s427_s22 = smov 88   ;;  %s151_s25 = smov 3 }
   0xf   :  { %v123_v35 = vsel %vm14_vm2, %v367_v32, %v118_v33  ;;  %v370_v37 = vld [vmem:[%s736_s0 + $0xa] ss:$16 sm:%s137_s16]   ;;  %v135_v38 = vsel %vm6_vm0, %v369_v36, %v368_v34  ;;  %s154_s26 = smov 12  ;;  %v372_v41 = vld [vmem:[%s736_s0 + $0x9] ss:$16 sm:%s151_s25]   ;;  %s159_s2 = smov 48 }
  0x10   :  { %124 = vrot.lane.b32.xlu0 %v123_v35, %s427_s22  ;;  %v371_v39 = vld [vmem:[%s736_s0 + $0xa] ss:$16 sm:%s142_s21]   ;;  %v140_v40 = vsel %vm10_vm1, %v370_v37, %v135_v38  ;;  %s164_s3 = smov 192  ;;  %s173_s8 = smov 3 }
  0x11   :  { %v373_v42 = vld [vmem:[%s736_s0 + $0x9] ss:$16 sm:%s154_s26]   ;;  %v145_v43 = vsel %vm14_vm2, %v371_v39, %v140_v40  ;;  %s428_s9 = smov 80   ;;  %v376_v48 = vld [vmem:[%s736_s0 + $0x8] ss:$16 sm:%s173_s8]   ;;  %s176_s12 = smov 12 }
  0x12   :  { %v157_v44 = vsel %vm6_vm0, %v373_v42, %v372_v41  ;;  %v374_v45 = vld [vmem:[%s736_s0 + $0x9] ss:$16 sm:%s159_s2]   ;;  %146 = vrot.lane.b32.xlu1 %v145_v43, %s428_s9  ;;  %s181_s13 = smov 48  ;;  %s186_s18 = smov 192 }
  0x13   :  { %v375_v46 = vld [vmem:[%s736_s0 + $0x9] ss:$16 sm:%s164_s3]   ;;  %v162_v47 = vsel %vm10_vm1, %v374_v45, %v157_v44  ;;  %v377_v50 = vld [vmem:[%s736_s0 + $0x8] ss:$16 sm:%s176_s12]   ;;  %s429_s19 = smov 72   ;;  %s195_s22 = smov 3 }
  0x14   :  { %v167_v49 = vsel %vm14_vm2, %v375_v46, %v162_v47  ;;  %v378_v51 = vld [vmem:[%s736_s0 + $0x8] ss:$16 sm:%s181_s13]   ;;  %v179_v52 = vsel %vm6_vm0, %v377_v50, %v376_v48  ;;  %s198_s23 = smov 12  ;;  %v380_v55 = vld [vmem:[%s736_s0 + $0x7] ss:$16 sm:%s195_s22]   ;;  %s203_s28 = smov 48 }
  0x15   :  { %168 = vrot.lane.b32.xlu0 %v167_v49, %s429_s19  ;;  %v379_v53 = vld [vmem:[%s736_s0 + $0x8] ss:$16 sm:%s186_s18]   ;;  %v184_v54 = vsel %vm10_vm1, %v378_v51, %v179_v52  ;;  %s208_s29 = smov 192  ;;  %s217_s5 = smov 3 }
  0x16   :  { %v381_v56 = vld [vmem:[%s736_s0 + $0x7] ss:$16 sm:%s198_s23]   ;;  %v189_v57 = vsel %vm14_vm2, %v379_v53, %v184_v54  ;;  %s430_s6 = smov 64   ;;  %v384_v62 = vld [vmem:[%s736_s0 + $0x6] ss:$16 sm:%s217_s5]   ;;  %s220_s9 = smov 12 }
  0x17   :  { %v201_v58 = vsel %vm6_vm0, %v381_v56, %v380_v55  ;;  %v382_v59 = vld [vmem:[%s736_s0 + $0x7] ss:$16 sm:%s203_s28]   ;;  %190 = vrot.lane.b32.xlu1 %v189_v57, %s430_s6  ;;  %s225_s10 = smov 48  ;;  %s230_s15 = smov 192 }
  0x18   :  { %v383_v60 = vld [vmem:[%s736_s0 + $0x7] ss:$16 sm:%s208_s29]   ;;  %v206_v61 = vsel %vm10_vm1, %v382_v59, %v201_v58  ;;  %v385_v0 = vld [vmem:[%s736_s0 + $0x6] ss:$16 sm:%s220_s9]   ;;  %s431_s16 = smov 56   ;;  %s239_s19 = smov 3 }
  0x19   :  { %v211_v63 = vsel %vm14_vm2, %v383_v60, %v206_v61  ;;  %v386_v1 = vld [vmem:[%s736_s0 + $0x6] ss:$16 sm:%s225_s10]   ;;  %v223_v2 = vsel %vm6_vm0, %v385_v0, %v384_v62  ;;  %s242_s20 = smov 12  ;;  %v388_v5 = vld [vmem:[%s736_s0 + $0x5] ss:$16 sm:%s239_s19]   ;;  %s247_s25 = smov 48 }
  0x1a   :  { %212 = vrot.lane.b32.xlu0 %v211_v63, %s431_s16  ;;  %v387_v3 = vld [vmem:[%s736_s0 + $0x6] ss:$16 sm:%s230_s15]   ;;  %v228_v4 = vsel %vm10_vm1, %v386_v1, %v223_v2  ;;  %s252_s26 = smov 192  ;;  %s261_s2 = smov 3 }
  0x1b   :  { %v389_v6 = vld [vmem:[%s736_s0 + $0x5] ss:$16 sm:%s242_s20]   ;;  %v233_v7 = vsel %vm14_vm2, %v387_v3, %v228_v4  ;;  %s432_s3 = smov 48   ;;  %v392_v12 = vld [vmem:[%s736_s0 + $0x4] ss:$16 sm:%s261_s2]   ;;  %s264_s6 = smov 12 }
  0x1c   :  { %v245_v8 = vsel %vm6_vm0, %v389_v6, %v388_v5  ;;  %v390_v9 = vld [vmem:[%s736_s0 + $0x5] ss:$16 sm:%s247_s25]   ;;  %234 = vrot.lane.b32.xlu1 %v233_v7, %s432_s3  ;;  %s269_s7 = smov 48  ;;  %s274_s12 = smov 192 }
  0x1d   :  { %v391_v10 = vld [vmem:[%s736_s0 + $0x5] ss:$16 sm:%s252_s26]   ;;  %v250_v11 = vsel %vm10_vm1, %v390_v9, %v245_v8  ;;  %v393_v14 = vld [vmem:[%s736_s0 + $0x4] ss:$16 sm:%s264_s6]   ;;  %s433_s13 = smov 40   ;;  %s283_s16 = smov 3 }
  0x1e   :  { %v255_v13 = vsel %vm14_vm2, %v391_v10, %v250_v11  ;;  %v394_v15 = vld [vmem:[%s736_s0 + $0x4] ss:$16 sm:%s269_s7]   ;;  %v267_v16 = vsel %vm6_vm0, %v393_v14, %v392_v12  ;;  %s286_s17 = smov 12  ;;  %v396_v19 = vld [vmem:[%s736_s0 + $0x3] ss:$16 sm:%s283_s16]   ;;  %s291_s22 = smov 48 }
  0x1f   :  { %256 = vrot.lane.b32.xlu0 %v255_v13, %s433_s13  ;;  %v395_v17 = vld [vmem:[%s736_s0 + $0x4] ss:$16 sm:%s274_s12]   ;;  %v272_v18 = vsel %vm10_vm1, %v394_v15, %v267_v16  ;;  %s296_s23 = smov 192  ;;  %s305_s28 = smov 3 }
  0x20   :  { %v397_v20 = vld [vmem:[%s736_s0 + $0x3] ss:$16 sm:%s286_s17]   ;;  %v277_v21 = vsel %vm14_vm2, %v395_v17, %v272_v18  ;;  %s434_s29 = smov 32   ;;  %v400_v26 = vld [vmem:[%s736_s0 + $0x2] ss:$16 sm:%s305_s28]   ;;  %s308_s3 = smov 12 }
  0x21   :  { %v289_v22 = vsel %vm6_vm0, %v397_v20, %v396_v19  ;;  %v398_v23 = vld [vmem:[%s736_s0 + $0x3] ss:$16 sm:%s291_s22]   ;;  %278 = vrot.lane.b32.xlu1 %v277_v21, %s434_s29  ;;  %s313_s4 = smov 48  ;;  %s318_s9 = smov 192 }
  0x22   :  { %v399_v24 = vld [vmem:[%s736_s0 + $0x3] ss:$16 sm:%s296_s23]   ;;  %v294_v25 = vsel %vm10_vm1, %v398_v23, %v289_v22  ;;  %v401_v28 = vld [vmem:[%s736_s0 + $0x2] ss:$16 sm:%s308_s3]   ;;  %s435_s10 = smov 24   ;;  %s327_s13 = smov 3 }
  0x23   :  { %v299_v27 = vsel %vm14_vm2, %v399_v24, %v294_v25  ;;  %v402_v29 = vld [vmem:[%s736_s0 + $0x2] ss:$16 sm:%s313_s4]   ;;  %v311_v30 = vsel %vm6_vm0, %v401_v28, %v400_v26  ;;  %s330_s14 = smov 12  ;;  %v404_v33 = vld [vmem:[%s736_s0 + $0x1] ss:$16 sm:%s327_s13]   ;;  %s335_s19 = smov 48 }
  0x24   :  { %300 = vrot.lane.b32.xlu0 %v299_v27, %s435_s10  ;;  %v403_v31 = vld [vmem:[%s736_s0 + $0x2] ss:$16 sm:%s318_s9]   ;;  %v316_v32 = vsel %vm10_vm1, %v402_v29, %v311_v30  ;;  %s340_s20 = smov 192  ;;  %s2_s25 = smov 3 }
  0x25   :  { %v405_v34 = vld [vmem:[%s736_s0 + $0x1] ss:$16 sm:%s330_s14]   ;;  %v321_v35 = vsel %vm14_vm2, %v403_v31, %v316_v32  ;;  %s436_s26 = smov 16   ;;  %s4_s27 = smov 12  ;;  %v3_v40 = vld [vmem:[%s736_s0] ss:$16 sm:%s2_s25]  }
  0x26   :  { %v333_v36 = vsel %vm6_vm0, %v405_v34, %v404_v33  ;;  %v406_v37 = vld [vmem:[%s736_s0 + $0x1] ss:$16 sm:%s335_s19]   ;;  %322 = vrot.lane.b32.xlu1 %v321_v35, %s436_s26  ;;  %s8_s28 = smov 48  ;;  %s12_s2 = smov 192 }
  0x27   :  { %v407_v38 = vld [vmem:[%s736_s0 + $0x1] ss:$16 sm:%s340_s20]   ;;  %v338_v39 = vsel %vm10_vm1, %v406_v37, %v333_v36  ;;  %v5_v42 = vld [vmem:[%s736_s0] ss:$16 sm:%s4_s27]   ;;  %s437_s7 = smov 8  }
  0x28   :  { %v343_v41 = vsel %vm14_vm2, %v407_v38, %v338_v39  ;;  %v9_v43 = vld [vmem:[%s736_s0] ss:$16 sm:%s8_s28]   ;;  %v7_v44 = vsel %vm6_vm0, %v5_v42, %v3_v40  ;;  %vm302_vm0 = vcmask 261312  }
  0x29   :  { %344 = vrot.lane.b32.xlu0 %v343_v41, %s437_s7  ;;  %v13_v45 = vld [vmem:[%s736_s0] ss:$16 sm:%s12_s2]   ;;  %v11_v46 = vsel %vm10_vm1, %v9_v43, %v7_v44  ;;  %vm324_vm1 = vcmask 195712  }
  0x2a   :  { %v15_v47 = vsel %vm14_vm2, %v13_v45, %v11_v46  ;;  %vm346_vm2 = vcmask 130112  }
  0x2b   :  { %17 = vst.msk [vmem:[%s737_s1] sm:$0xff] %vm16_vm3, %v15_v47  }
  0x78   :  { %v37_v48 = vpop.permute.xlu0 %36  }
  0x79   :  { %39 = vst.msk [vmem:[%s737_s1] sm:$0xff] %vm38_vm4, %v37_v48  }
  0x7a   :  { %v81_v49 = vpop.permute.xlu1 %80  }
  0x7d   :  { %v59_v50 = vpop.permute.xlu0 %58  }
  0x7e   :  { %61 = vst.msk [vmem:[%s737_s1] sm:$0xff] %vm60_vm5, %v59_v50  }
  0x7f   :  { %83 = vst.msk [vmem:[%s737_s1] sm:$0xff] %vm82_vm6, %v81_v49   ;;  %v103_v51 = vpop.permute.xlu1 %102  }
  0x80   :  { %105 = vst.msk [vmem:[%s737_s1] sm:$0xff] %vm104_vm7, %v103_v51  }
  0x82   :  { %v125_v52 = vpop.permute.xlu0 %124  }
  0x83   :  { %127 = vst.msk [vmem:[%s737_s1] sm:$0xff] %vm126_vm8, %v125_v52  }
  0x84   :  { %v147_v53 = vpop.permute.xlu1 %146  }
  0x85   :  { %149 = vst.msk [vmem:[%s737_s1] sm:$0xff] %vm148_vm9, %v147_v53  }
  0x87   :  { %v169_v54 = vpop.permute.xlu0 %168  }
  0x88   :  { %171 = vst.msk [vmem:[%s737_s1] sm:$0xff] %vm170_vm10, %v169_v54  }
  0x89   :  { %v191_v55 = vpop.permute.xlu1 %190  }
  0x8a   :  { %193 = vst.msk [vmem:[%s737_s1] sm:$0xff] %vm192_vm11, %v191_v55  }
  0x8c   :  { %v213_v56 = vpop.permute.xlu0 %212  }
  0x8d   :  { %215 = vst.msk [vmem:[%s737_s1] sm:$0xff] %vm214_vm12, %v213_v56  }
  0x8e   :  { %v235_v57 = vpop.permute.xlu1 %234  }
  0x8f   :  { %237 = vst.msk [vmem:[%s737_s1] sm:$0xff] %vm236_vm13, %v235_v57  }
  0x91   :  { %v257_v58 = vpop.permute.xlu0 %256  }
  0x92   :  { %259 = vst.msk [vmem:[%s737_s1] sm:$0xff] %vm258_vm14, %v257_v58  }
  0x93   :  { %v279_v59 = vpop.permute.xlu1 %278  }
  0x94   :  { %281 = vst.msk [vmem:[%s737_s1] sm:$0xff] %vm280_vm15, %v279_v59  }
  0x96   :  { %v301_v60 = vpop.permute.xlu0 %300  }
  0x97   :  { %303 = vst.msk [vmem:[%s737_s1] sm:$0xff] %vm302_vm0, %v301_v60  }
  0x98   :  { %v323_v61 = vpop.permute.xlu1 %322  }
  0x99   :  { %325 = vst.msk [vmem:[%s737_s1] sm:$0xff] %vm324_vm1, %v323_v61  }
  0x9b   :  { %v345_v62 = vpop.permute.xlu0 %344  }
  0x9c   :  { %347 = vst.msk [vmem:[%s737_s1] sm:$0xff] %vm346_vm2, %v345_v62  }

// kernel: double_conv_block.1
= control target key start
LH: loop header
LB: loop body
LE: loop exit
PB: predicated region body
PF: predicated region fallthrough
CT: control target
= control target key end

     0   :  { %vm38_vm0 = vcmask 516096   ;;  %vm47_vm1 = vcmask 523264   ;;  %v3074_v3 = vmov 0.0   ;;  %v3075_v56 = vmov 0.0|0.0   ;;  %s3625_s1 = inlined_call_operand.vmem [shape: f32[3,64,128], index: 1, kind: input, shape index: {}]   ;;  %s3626_s0 = inlined_call_operand.vmem [shape: f32[2,16,64], index: 0, kind: input, shape index: {}]   ;;  %s3627_s7 = inlined_call_operand.vmem [shape: f32[128,8], index: 7, kind: input, shape index: {}, may-alias: {7,9}]   ;;  %s3628_s8 = inlined_call_operand.vmem [shape: f32[8,128], index: 8, kind: input, shape index: {}, may-alias: {8,10}]   ;;  %s3629_s2 = inlined_call_operand.vmem [shape: f32[3,128,128], index: 2, kind: input, shape index: {}]   ;;  %s3630_s3 = inlined_call_operand.vmem [shape: f32[1,8], index: 3, kind: input, shape index: {}]   ;;  %s3631_s4 = inlined_call_operand.vmem [shape: f32[1,8], index: 4, kind: input, shape index: {}]   ;;  %s3632_s9 = inlined_call_operand.vmem [shape: f32[128,8], index: 9, kind: input, shape index: {}, may-alias: {7,9}]   ;;  %s3633_s10 = inlined_call_operand.vmem [shape: f32[8,128], index: 10, kind: input, shape index: {}, may-alias: {8,10}]   ;;  %s3634_s5 = inlined_call_operand.vmem [shape: f32[1,8], index: 5, kind: input, shape index: {}]   ;;  %s3635_s6 = inlined_call_operand.vmem [shape: f32[1,8], index: 6, kind: input, shape index: {}]   ;;  %s3636_s11 = inlined_call_operand.vmem [shape: f32[32,128], index: 11, kind: output, shape index: {}]  }
   0x1   :  { %v1871_v0 = vld [vmem:[%s3625_s1 + $0x40] sm:$0xff]  ;;  %v1872_v1 = vld [vmem:[%s3625_s1 + $0x48] sm:$0xff]  ;;  %v1873_v2 = vld [vmem:[%s3625_s1 + $0x50] sm:$0xff]  ;;  %39 = vst.msk [vmem:[#allocation2] sm:$0x1] %vm38_vm0, %v3074_v3  ;;  %vm3076_vm2 = vmmov 0  }
   0x2   :  { %40 = vst.msk [vmem:[#allocation2 + $0x18] sm:$0x1] %vm38_vm0, %v3074_v3  ;;  %41 = vst.msk [vmem:[#allocation2 + $0x11] sm:$0x1] %vm38_vm0, %v3074_v3  ;;  %v2663_v4 = vpack.c.bf16 %v1872_v1, %v1871_v0  ;;  %v1874_v5 = vld [vmem:[%s3625_s1 + $0x58] sm:$0xff]  ;;  %v1875_v7 = vld [vmem:[%s3625_s1 + $0x60] sm:$0xff] }
   0x3   :  { %42 = vst.msk [vmem:[#allocation2 + $0x29] sm:$0x1] %vm38_vm0, %v3074_v3  ;;  %940 = vst [vmem:[#allocation3] sm:$0x1] %v3074_v3  ;;  %v2667_v6 = vpack.c.bf16 %v1874_v5, %v1873_v2  ;;  %v1876_v8 = vld [vmem:[%s3625_s1 + $0x68] sm:$0xff]  ;;  %v43_v9 = vld [vmem:[%s3626_s0] sm:$0xff] }
   0x4   :  { %941 = vst [vmem:[#allocation3 + $0x18] sm:$0x1] %v3074_v3  ;;  %942 = vst [vmem:[#allocation3 + $0x11] sm:$0x1] %v3074_v3  ;;  %2664 = vmatprep.subr.bf16.mxu0 %v2663_v4  ;;  %2712 = vmatprep.subr.bf16.mxu1 %v2663_v4  ;;  %v45_v10 = vld [vmem:[%s3626_s0 + $0x10] sm:$0xff]  ;;  %v44_v11 = vld [vmem:[%s3626_s0 + $0x8] sm:$0xff]  ;;  %v2671_v13 = vpack.c.bf16 %v1876_v8, %v1875_v7 }
   0x5   :  { %943 = vst [vmem:[#allocation3 + $0x29] sm:$0x1] %v3074_v3  ;;  %48 = vst.msk [vmem:[#allocation2 + $0x1] sm:$0xff] %vm47_vm1, %v43_v9  ;;  %2666 = vmatpush3.bf16.msra.mxu0 %v2663_v4  ;;  %2714 = vmatpush3.bf16.msra.mxu1 %v2663_v4  ;;  %v46_v12 = vld [vmem:[%s3626_s0 + $0x18] sm:$0xff]  ;;  %v1877_v14 = vld [vmem:[%s3625_s1 + $0x70] sm:$0xff]  ;;  %vm793_vm5 = vcmask 64512  }
   0x6   :  { %50 = vst.msk [vmem:[#allocation2 + $0x19] sm:$0xff] %vm47_vm1, %v45_v10  ;;  %2668 = vmatprep.subr.bf16.mxu0 %v2667_v6  ;;  %2716 = vmatprep.subr.bf16.mxu1 %v2667_v6  ;;  %49 = vst.msk [vmem:[#allocation2 + $0x9] sm:$0xff] %vm47_vm1, %v44_v11  ;;  %v1878_v15 = vld [vmem:[%s3625_s1 + $0x78] sm:$0xff]  ;;  %v52_v18 = vld [vmem:[%s3625_s1] sm:$0xff] }
   0x7   :  { %51 = vst.msk [vmem:[#allocation2 + $0x21] sm:$0xff] %vm47_vm1, %v46_v12  ;;  %v2675_v16 = vpack.c.bf16 %v1878_v15, %v1877_v14  ;;  %v53_v19 = vld [vmem:[%s3625_s1 + $0x8] sm:$0xff]  ;;  %v54_v22 = vld [vmem:[%s3625_s1 + $0x10] sm:$0xff]  ;;  %v55_v23 = vld [vmem:[%s3625_s1 + $0x18] sm:$0xff] }
   0x8   :  { %v2679_v21 = vpack.c.bf16 %v53_v19, %v52_v18  ;;  %v2683_v26 = vpack.c.bf16 %v55_v23, %v54_v22  ;;  %v56_v27 = vld [vmem:[%s3625_s1 + $0x20] sm:$0xff]  ;;  %v57_v28 = vld [vmem:[%s3625_s1 + $0x28] sm:$0xff]  ;;  %v58_v32 = vld [vmem:[%s3625_s1 + $0x30] sm:$0xff] }
   0x9   :  { %2670 = vmatpush3.bf16.msra.mxu0 %v2667_v6  ;;  %2718 = vmatpush3.bf16.msra.mxu1 %v2667_v6  ;;  %v2687_v31 = vpack.c.bf16 %v57_v28, %v56_v27  ;;  %v59_v33 = vld [vmem:[%s3625_s1 + $0x38] sm:$0xff]  ;;  %v1879_v35 = vld [vmem:[%s3625_s1 + $0x80] sm:$0xff]  ;;  %v1880_v36 = vld [vmem:[%s3625_s1 + $0x88] sm:$0xff] }
   0xa   :  { %2672 = vmatprep.subr.bf16.mxu0 %v2671_v13  ;;  %2720 = vmatprep.subr.bf16.mxu1 %v2671_v13  ;;  %v2691_v34 = vpack.c.bf16 %v59_v33, %v58_v32  ;;  %v2695_v37 = vpack.c.bf16 %v1880_v36, %v1879_v35  ;;  %v1881_v38 = vld [vmem:[%s3625_s1 + $0x90] sm:$0xff]  ;;  %v1882_v39 = vld [vmem:[%s3625_s1 + $0x98] sm:$0xff]  ;;  %v1883_v43 = vld [vmem:[%s3625_s1 + $0xa0] sm:$0xff] }
   0xb   :  { %v2699_v42 = vpack.c.bf16 %v1882_v39, %v1881_v38  ;;  %v1884_v44 = vld [vmem:[%s3625_s1 + $0xa8] sm:$0xff]  ;;  %v1885_v48 = vld [vmem:[%s3625_s1 + $0xb0] sm:$0xff]  ;;  %v1886_v49 = vld [vmem:[%s3625_s1 + $0xb8] sm:$0xff] }
   0xc   :  { %v80_v17 = vld [vmem:[#allocation2 + $0x1] sm:$0xff]  ;;  %v2703_v47 = vpack.c.bf16 %v1884_v44, %v1883_v43  ;;  %v2707_v50 = vpack.c.bf16 %v1886_v49, %v1885_v48  ;;  %v619_v57 = vld [vmem:[%s3627_s7 + $0x10] sm:$0xff]  ;;  %v620_v58 = vld [vmem:[%s3627_s7 + $0x18] sm:$0xff] }
   0xd   :  { %2195 = vmatprep.mubr.msk.f32.mxu0 %vm47_vm1, %v80_v17  ;;  %v350_v20 = vld [vmem:[#allocation2 + $0x19] sm:$0xff]  ;;  %2674 = vmatpush3.bf16.msra.mxu0 %v2671_v13  ;;  %v81_v24 = vld [vmem:[#allocation2 + $0x9] sm:$0xff]  ;;  %v2763_v59 = vpack.c.bf16 %v620_v58, %v619_v57 }
   0xe   :  { %2722 = vmatpush3.bf16.msra.mxu1 %v2671_v13  ;;  %2676 = vmatprep.subr.bf16.mxu0 %v2675_v16  ;;  %v351_v25 = vld [vmem:[#allocation2 + $0x21] sm:$0xff]  ;;  %v348_v30 = vld [vmem:[#allocation2 + $0x18] sm:$0xff]  ;;  %v245_v53 = vld [vmem:[#allocation2 + $0xa] sm:$0xff] }
   0xf   :  { %2724 = vmatprep.subr.bf16.mxu1 %v2675_v16  ;;  %2252 = vmatprep.mubr.msk.f32.mxu1 %vm47_vm1, %v350_v20  ;;  %v78_v29 = vld [vmem:[#allocation2] sm:$0xff]  ;;  %v79_v40 = vld [vmem:[#allocation2 + $0x8] sm:$0xff]  ;;  %v623_v63 = vld [vmem:[%s3627_s7 + $0x30] sm:$0xff] }
  0x10   :  { %v349_v41 = vld [vmem:[#allocation2 + $0x20] sm:$0xff]  ;;  %v618_v52 = vld [vmem:[%s3627_s7 + $0x8] sm:$0xff]  ;;  %v624_v0 = vld [vmem:[%s3627_s7 + $0x38] sm:$0xff] }
  0x11   :  { %2678 = vmatpush3.bf16.msra.mxu0 %v2675_v16  ;;  %v244_v45 = vld [vmem:[#allocation2 + $0x2] sm:$0xff]  ;;  %v514_v46 = vld [vmem:[#allocation2 + $0x1a] sm:$0xff]  ;;  %v2769_v1 = vpack.c.bf16 %v624_v0, %v623_v63  ;;  %v627_v6 = vld [vmem:[%s3627_s7 + $0x50] sm:$0xff] }
  0x12   :  { %2726 = vmatpush3.bf16.msra.mxu1 %v2675_v16  ;;  %2680 = vmatprep.subr.bf16.mxu0 %v2679_v21  ;;  %v617_v51 = vld [vmem:[%s3627_s7] sm:$0xff]  ;;  %v622_v61 = vld [vmem:[%s3627_s7 + $0x28] sm:$0xff]  ;;  %v628_v7 = vld [vmem:[%s3627_s7 + $0x58] sm:$0xff] }
  0x13   :  { %2728 = vmatprep.subr.bf16.mxu1 %v2679_v21  ;;  %v515_v54 = vld [vmem:[#allocation2 + $0x22] sm:$0xff]  ;;  %v2760_v55 = vpack.c.bf16 %v618_v52, %v617_v51  ;;  %v2775_v8 = vpack.c.bf16 %v628_v7, %v627_v6  ;;  %v631_v12 = vld [vmem:[%s3627_s7 + $0x70] sm:$0xff]  ;;  %v632_v13 = vld [vmem:[%s3627_s7 + $0x78] sm:$0xff] }
  0x14   :  { %2196 = vmatmul.mubr.msk.f32.vlgmr.msra.gmra.mrb[0].mxu0 %vm47_vm1, %v81_v24  ;;  %v621_v60 = vld [vmem:[%s3627_s7 + $0x20] sm:$0xff]  ;;  %v626_v4 = vld [vmem:[%s3627_s7 + $0x48] sm:$0xff]  ;;  %v2781_v14 = vpack.c.bf16 %v632_v13, %v631_v12  ;;  %v1904_v12 = vld [vmem:[%s3629_s2 + $0x98] sm:$0xff] }
  0x15   :  { %2253 = vmatmul.mubr.msk.f32.vlgmr.msra.gmra.mrb[0].mxu1 %vm47_vm1, %v351_v25  ;;  %2682 = vmatpush3.bf16.msra.mxu0 %v2679_v21  ;;  %v2766_v62 = vpack.c.bf16 %v622_v61, %v621_v60  ;;  %v625_v2 = vld [vmem:[%s3627_s7 + $0x40] sm:$0xff]  ;;  %v630_v10 = vld [vmem:[%s3627_s7 + $0x68] sm:$0xff] }
  0x16   :  { %2730 = vmatpush3.bf16.msra.mxu1 %v2679_v21  ;;  %2684 = vmatprep.subr.bf16.mxu0 %v2683_v26  ;;  %v2772_v5 = vpack.c.bf16 %v626_v4, %v625_v2  ;;  %v629_v9 = vld [vmem:[%s3627_s7 + $0x60] sm:$0xff] }
  0x17   :  { %2732 = vmatprep.subr.bf16.mxu1 %v2683_v26  ;;  %2214 = vmatprep.mubr.msk.f32.mxu0 %vm47_vm1, %v78_v29  ;;  %v2778_v11 = vpack.c.bf16 %v630_v10, %v629_v9  ;;  %v634_v10 = vld [vmem:[%s3630_s3] sm:$0x1] }
  0x18   :  { %2271 = vmatprep.mubr.msk.f32.mxu1 %vm47_vm1, %v348_v30 }
  0x19   :  { %2686 = vmatpush3.bf16.msra.mxu0 %v2683_v26 }
  0x1a   :  { %2734 = vmatpush3.bf16.msra.mxu1 %v2683_v26  ;;  %2688 = vmatprep.subr.bf16.mxu0 %v2687_v31 }
  0x1b   :  { %2736 = vmatprep.subr.bf16.mxu1 %v2687_v31 }
  0x1d   :  { %2690 = vmatpush3.bf16.msra.mxu0 %v2687_v31 }
  0x1e   :  { %2738 = vmatpush3.bf16.msra.mxu1 %v2687_v31  ;;  %2692 = vmatprep.subr.bf16.mxu0 %v2691_v34 }
  0x1f   :  { %2740 = vmatprep.subr.bf16.mxu1 %v2691_v34 }
  0x21   :  { %2694 = vmatpush3.bf16.msra.mxu0 %v2691_v34 }
  0x22   :  { %2742 = vmatpush3.bf16.msra.mxu1 %v2691_v34  ;;  %2696 = vmatprep.subr.bf16.mxu0 %v2695_v37 }
  0x23   :  { %2744 = vmatprep.subr.bf16.mxu1 %v2695_v37 }
  0x24   :  { %2215 = vmatmul.mubr.msk.f32.vlgmr.msra.gmra.mrb[0].mxu0 %vm47_vm1, %v79_v40 }
  0x25   :  { %2272 = vmatmul.mubr.msk.f32.vlgmr.msra.gmra.mrb[0].mxu1 %vm47_vm1, %v349_v41  ;;  %2698 = vmatpush3.bf16.msra.mxu0 %v2695_v37 }
  0x26   :  { %2746 = vmatpush3.bf16.msra.mxu1 %v2695_v37  ;;  %2700 = vmatprep.subr.bf16.mxu0 %v2699_v42 }
  0x27   :  { %2748 = vmatprep.subr.bf16.mxu1 %v2699_v42  ;;  %2233 = vmatprep.mubr.msk.f32.mxu0 %vm47_vm1, %v244_v45 }
  0x28   :  { %2290 = vmatprep.mubr.msk.f32.mxu1 %vm47_vm1, %v514_v46 }
  0x29   :  { %2702 = vmatpush3.bf16.msra.mxu0 %v2699_v42 }
  0x2a   :  { %2750 = vmatpush3.bf16.msra.mxu1 %v2699_v42  ;;  %2704 = vmatprep.subr.bf16.mxu0 %v2703_v47 }
  0x2b   :  { %2752 = vmatprep.subr.bf16.mxu1 %v2703_v47 }
  0x2d   :  { %2706 = vmatpush3.bf16.msra.mxu0 %v2703_v47 }
  0x2e   :  { %2754 = vmatpush3.bf16.msra.mxu1 %v2703_v47  ;;  %2708 = vmatprep.subr.bf16.mxu0 %v2707_v50 }
  0x2f   :  { %2756 = vmatprep.subr.bf16.mxu1 %v2707_v50 }
  0x31   :  { %2710 = vmatpush3.bf16.msra.mxu0 %v2707_v50 }
  0x32   :  { %2758 = vmatpush3.bf16.msra.mxu1 %v2707_v50  ;;  %2759 = vmatprep.subr.bf16.mxu0 %v3075_v56 }
  0x33   :  { %2783 = vmatprep.subr.bf16.mxu1 %v3075_v56 }
  0x34   :  { %2234 = vmatmul.mubr.msk.f32.vlgmr.msra.gmra.mrb[0].mxu0 %vm47_vm1, %v245_v53  ;;  %v633_v53 = vld [vmem:[%s3628_s8] sm:$0xff] }
  0x35   :  { %2291 = vmatmul.mubr.msk.f32.vlgmr.msra.gmra.mrb[0].mxu1 %vm47_vm1, %v515_v54  ;;  %2761 = vmatpush3.bf16.msra.mxu0 %v2760_v55  ;;  %v1901_v54 = vld [vmem:[%s3629_s2 + $0x80] sm:$0xff] }
  0x36   :  { %2785 = vmatpush3.bf16.msra.mxu1 %v2760_v55  ;;  %2762 = vmatprep.subr.bf16.mxu0 %v3075_v56  ;;  %v1902_v55 = vld [vmem:[%s3629_s2 + $0x88] sm:$0xff] }
  0x37   :  { %2786 = vmatprep.subr.bf16.mxu1 %v3075_v56  ;;  %2325 = vmatprep.mubr.msk.f32.mxu0 %vm3076_vm2, %v3074_v3  ;;  %v2807_v57 = vpack.c.bf16 %v1902_v55, %v1901_v54 }
  0x38   :  { %2360 = vmatprep.mubr.msk.f32.mxu1 %vm3076_vm2, %v3074_v3 }
  0x39   :  { %2764 = vmatpush3.bf16.msra.mxu0 %v2763_v59 }
  0x3a   :  { %2788 = vmatpush3.bf16.msra.mxu1 %v2763_v59  ;;  %2765 = vmatprep.subr.bf16.mxu0 %v3075_v56 }
  0x3b   :  { %2789 = vmatprep.subr.bf16.mxu1 %v3075_v56 }
  0x3d   :  { %2767 = vmatpush3.bf16.msra.mxu0 %v2766_v62 }
  0x3e   :  { %2791 = vmatpush3.bf16.msra.mxu1 %v2766_v62  ;;  %2768 = vmatprep.subr.bf16.mxu0 %v3075_v56 }
  0x3f   :  { %2792 = vmatprep.subr.bf16.mxu1 %v3075_v56 }
  0x41   :  { %2770 = vmatpush3.bf16.msra.mxu0 %v2769_v1 }
  0x42   :  { %2794 = vmatpush3.bf16.msra.mxu1 %v2769_v1  ;;  %2771 = vmatprep.subr.bf16.mxu0 %v3075_v56 }
  0x43   :  { %2795 = vmatprep.subr.bf16.mxu1 %v3075_v56 }
  0x45   :  { %2773 = vmatpush3.bf16.msra.mxu0 %v2772_v5 }
  0x46   :  { %2797 = vmatpush3.bf16.msra.mxu1 %v2772_v5  ;;  %2774 = vmatprep.subr.bf16.mxu0 %v3075_v56 }
  0x47   :  { %2798 = vmatprep.subr.bf16.mxu1 %v3075_v56 }
  0x49   :  { %2776 = vmatpush3.bf16.msra.mxu0 %v2775_v8 }
  0x4a   :  { %2800 = vmatpush3.bf16.msra.mxu1 %v2775_v8  ;;  %2777 = vmatprep.subr.bf16.mxu0 %v3075_v56 }
  0x4b   :  { %2801 = vmatprep.subr.bf16.mxu1 %v3075_v56 }
  0x4d   :  { %2779 = vmatpush3.bf16.msra.mxu0 %v2778_v11 }
  0x4e   :  { %2803 = vmatpush3.bf16.msra.mxu1 %v2778_v11  ;;  %2780 = vmatprep.subr.bf16.mxu0 %v3075_v56  ;;  %v1903_v11 = vld [vmem:[%s3629_s2 + $0x90] sm:$0xff] }
  0x4f   :  { %2804 = vmatprep.subr.bf16.mxu1 %v3075_v56 }
  0x51   :  { %2782 = vmatpush3.bf16.msra.mxu0 %v2781_v14 }
  0x52   :  { %2806 = vmatpush3.bf16.msra.mxu1 %v2781_v14  ;;  %2363 = vmatprep.subr.mxu0 %v3074_v3 }
  0x53   :  { %2368 = vmatprep.subr.mxu1 %v3074_v3 }
 0x107   :  { %v3315_v15 = vpop.f32.mrb[0].mxu0 }
 0x108   :  { %v3317_v16 = vpop.f32.mrb[0].mxu1  ;;  %v338_v17 = vmul.f32 %v3315_v15, %v3315_v15  ;;  %v3323_v19 = vpop.f32.mrb[1].mxu0 }
 0x109   :  { %v608_v18 = vmul.f32 %v3317_v16, %v3317_v16  ;;  %v3325_v20 = vpop.f32.mrb[1].mxu1  ;;  %v329_v21 = vadd.f32 %v3315_v15, %v3323_v19  ;;  %v337_v22 = vmul.f32 %v3323_v19, %v3323_v19 }
 0x10a   :  { %v599_v23 = vadd.f32 %v3317_v16, %v3325_v20  ;;  %v607_v24 = vmul.f32 %v3325_v20, %v3325_v20 }
 0x10b   :  { %v330_v25 = vrot.slane %v329_v21, 4  ;;  %v339_v26 = vadd.f32 %v338_v17, %v337_v22  ;;  %v2811_v17 = vpack.c.bf16 %v1904_v12, %v1903_v11  ;;  %v1906_v22 = vld [vmem:[%s3629_s2 + $0xa8] sm:$0xff] }
 0x10c   :  { %v600_v27 = vrot.slane %v599_v23, 4  ;;  %v609_v28 = vadd.f32 %v608_v18, %v607_v24  ;;  %v635_v18 = vld [vmem:[%s3631_s4] sm:$0x1]  ;;  %v978_v11 = vld [vmem:[%s3629_s2 + $0x48] sm:$0xff] }
 0x10d   :  { %v331_v29 = vadd.f32 %v330_v25, %v329_v21  ;;  %v340_v30 = vrot.slane %v339_v26, 4  ;;  %v1905_v21 = vld [vmem:[%s3629_s2 + $0xa0] sm:$0xff] }
 0x10e   :  { %v601_v31 = vadd.f32 %v600_v27, %v599_v23  ;;  %v610_v32 = vrot.slane %v609_v28, 4  ;;  %v2815_v25 = vpack.c.bf16 %v1906_v22, %v1905_v21  ;;  %v1908_v27 = vld [vmem:[%s3629_s2 + $0xb8] sm:$0xff]  ;;  %v982_v21 = vld [vmem:[%s3629_s2 + $0x68] sm:$0xff] }
 0x10f   :  { %v332_v33 = vrot.slane %v331_v29, 2  ;;  %v341_v34 = vadd.f32 %v340_v30, %v339_v26  ;;  %v1907_v26 = vld [vmem:[%s3629_s2 + $0xb0] sm:$0xff]  ;;  %v1910_v30 = vld [vmem:[%s3629_s2 + $0xc8] sm:$0xff] }
 0x110   :  { %v602_v35 = vrot.slane %v601_v31, 2  ;;  %v611_v36 = vadd.f32 %v610_v32, %v609_v28  ;;  %v2819_v28 = vpack.c.bf16 %v1908_v27, %v1907_v26  ;;  %v1911_v32 = vld [vmem:[%s3629_s2 + $0xd0] sm:$0xff]  ;;  %v1917_v26 = vld [vmem:[%s3629_s2 + $0x100] sm:$0xff]  ;;  %v1918_v27 = vld [vmem:[%s3629_s2 + $0x108] sm:$0xff] }
 0x111   :  { %v333_v37 = vadd.f32 %v332_v33, %v331_v29  ;;  %v342_v38 = vrot.slane %v341_v34, 2  ;;  %v1909_v29 = vld [vmem:[%s3629_s2 + $0xc0] sm:$0xff]  ;;  %v1912_v33 = vld [vmem:[%s3629_s2 + $0xd8] sm:$0xff] }
 0x112   :  { %v603_v39 = vadd.f32 %v602_v35, %v601_v31  ;;  %v612_v40 = vrot.slane %v611_v36, 2  ;;  %v2823_v31 = vpack.c.bf16 %v1910_v30, %v1909_v29  ;;  %v1913_v35 = vld [vmem:[%s3629_s2 + $0xe0] sm:$0xff]  ;;  %v1919_v29 = vld [vmem:[%s3629_s2 + $0x110] sm:$0xff]  ;;  %v1920_v30 = vld [vmem:[%s3629_s2 + $0x118] sm:$0xff] }
 0x113   :  { %v334_v41 = vrot.slane %v333_v37, 1  ;;  %v343_v42 = vadd.f32 %v342_v38, %v341_v34  ;;  %v2827_v34 = vpack.c.bf16 %v1912_v33, %v1911_v32  ;;  %v1915_v38 = vld [vmem:[%s3629_s2 + $0xf0] sm:$0xff] }
 0x114   :  { %v604_v43 = vrot.slane %v603_v39, 1  ;;  %v613_v44 = vadd.f32 %v612_v40, %v611_v36  ;;  %v1914_v36 = vld [vmem:[%s3629_s2 + $0xe8] sm:$0xff] }
 0x115   :  { %v335_v45 = vadd.f32 %v334_v41, %v333_v37  ;;  %v344_v47 = vrot.slane %v343_v42, 1  ;;  %v2831_v37 = vpack.c.bf16 %v1914_v36, %v1913_v35  ;;  %v969_v41 = vld [vmem:[%s3629_s2] sm:$0xff]  ;;  %v1922_v35 = vld [vmem:[%s3629_s2 + $0x128] sm:$0xff] }
 0x116   :  { %v605_v46 = vadd.f32 %v604_v43, %v603_v39  ;;  %v614_v48 = vrot.slane %v613_v44, 1  ;;  %v1916_v39 = vld [vmem:[%s3629_s2 + $0xf8] sm:$0xff] }
 0x117   :  { %v345_v50 = vadd.f32 %v344_v47, %v343_v42  ;;  %v2835_v40 = vpack.c.bf16 %v1916_v39, %v1915_v38  ;;  %v970_v42 = vld [vmem:[%s3629_s2 + $0x8] sm:$0xff]  ;;  %v1923_v39 = vld [vmem:[%s3629_s2 + $0x130] sm:$0xff] }
 0x118   :  { %v606_v49 = vadd.f32 %v605_v46, %v335_v45  ;;  %v615_v51 = vadd.f32 %v614_v48, %v613_v44  ;;  %v2839_v43 = vpack.c.bf16 %v970_v42, %v969_v41  ;;  %v944_v44 = vlaneseq  ;;  %v1925_v42 = vld [vmem:[%s3629_s2 + $0x140] sm:$0xff] }
 0x11a   :  { %2326 = vmatmul.mubr.f32.vlgmr.msra.gmra.mrb[2].mxu0 %v606_v49  ;;  %v616_v52 = vadd.f32 %v615_v51, %v345_v50  ;;  %v945_v45 = vshrl.u32 %v944_v44, 7 }
 0x11b   :  { %2365 = vmatprep.mubr.msk.f32.mxu0 %vm3076_vm2, %v3074_v3  ;;  %2364 = vmatpush3.msra.mxu0 %v633_v53 }
 0x11c   :  { %2361 = vmatmul.mubr.f32.vlgmr.msra.gmra.mrb[2].mxu1 %v616_v52  ;;  %2808 = vmatprep.subr.bf16.mxu0 %v2807_v57  ;;  %v3404_v46 = vsub.s32 0, %v945_v45  ;;  %v1927_v45 = vld [vmem:[%s3629_s2 + $0x150] sm:$0xff] }
 0x11d   :  { %2370 = vmatprep.mubr.msk.f32.mxu1 %vm3076_vm2, %v3074_v3  ;;  %2369 = vmatpush3.msra.mxu1 %v633_v53 }
 0x11e   :  { %2904 = vmatprep.subr.bf16.mxu1 %v2807_v57 }
 0x1ed   :  { %v702_v58 = vpop.f32.mrb[2].mxu0 }
 0x1ee   :  { %v776_v59 = vmul.f32 0.001953125, %v702_v58  ;;  %v2327_v60 = vpop.f32.mrb[3].mxu0 }
 0x1ef   :  { %v772_v61 = vpop.f32.mrb[2].mxu1 }
 0x1f0   :  { %v778_v62 = vmul.f32 %v776_v59, %v776_v59  ;;  %v777_v63 = vmul.f32 0.001953125, %v772_v61  ;;  %v2362_v0 = vpop.f32.mrb[3].mxu1 }
 0x1f2   :  { %v779_v1 = vsub.f32 %v777_v63, %v778_v62  ;;  %v971_v62 = vld [vmem:[%s3629_s2 + $0x10] sm:$0xff] }
 0x1f4   :  { %v780_v2 = vmax.f32 %v779_v1, 0.0  ;;  %v973_v1 = vld [vmem:[%s3629_s2 + $0x20] sm:$0xff] }
 0x1f6   :  { %v781_v4 = vadd.f32 1e-05, %v780_v2  ;;  %v974_v2 = vld [vmem:[%s3629_s2 + $0x28] sm:$0xff] }
 0x1f8   :  { %3066 = vrsqrt.f32 %v781_v4  ;;  %vm784_vm3 = vcmp.eq.f32.partialorder %v781_v4, inf  ;;  %v787_v7 = vand.u32 2147483648, %v781_v4  ;;  %vm786_vm4 = vcmp.eq.f32.partialorder %v781_v4, 0.0 }
 0x202   :  { %v3067_v5 = vpop.eup %3066 }
 0x203   :  { %v783_v6 = vmul.f32 %v3067_v5, %v781_v4  ;;  %v975_v5 = vld [vmem:[%s3629_s2 + $0x30] sm:$0xff] }
 0x205   :  { %v785_v8 = vsel %vm784_vm3, %v781_v4, %v783_v6  ;;  %v2847_v4 = vpack.c.bf16 %v974_v2, %v973_v1  ;;  %v976_v6 = vld [vmem:[%s3629_s2 + $0x38] sm:$0xff]  ;;  %v1529_v2 = vld [vmem:[%s3632_s9 + $0x40] sm:$0xff] }
 0x206   :  { %v788_v9 = vsel %vm786_vm4, %v787_v7, %v785_v8 }
 0x207   :  { %3068 = vrcp.f32 %v788_v9  ;;  %v2851_v9 = vpack.c.bf16 %v976_v6, %v975_v5  ;;  %v1531_v6 = vld [vmem:[%s3632_s9 + $0x50] sm:$0xff] }
 0x211   :  { %v3069_v13 = vpop.eup %3068 }
 0x212   :  { %v790_v14 = vmul.f32 %v3069_v13, %v634_v10  ;;  %v977_v10 = vld [vmem:[%s3629_s2 + $0x40] sm:$0xff]  ;;  %v979_v13 = vld [vmem:[%s3629_s2 + $0x50] sm:$0xff] }
 0x213   :  { %v2855_v12 = vpack.c.bf16 %v978_v11, %v977_v10  ;;  %v1534_v10 = vld [vmem:[%s3632_s9 + $0x68] sm:$0xff] }
 0x214   :  { %2366 = vmatmul.mubr.msk.f32.vlgmr.msra.gmra.mrb[4].mxu0 %vm793_vm5, %v790_v14  ;;  %v791_v23 = vmul.f32 %v790_v14, %v776_v59  ;;  %v980_v14 = vld [vmem:[%s3629_s2 + $0x58] sm:$0xff] }
 0x215   :  { %2810 = vmatpush3.bf16.msra.mxu0 %v2807_v57 }
 0x216   :  { %v792_v24 = vsub.f32 %v635_v18, %v791_v23  ;;  %2812 = vmatprep.subr.bf16.mxu0 %v2811_v17  ;;  %v981_v18 = vld [vmem:[%s3629_s2 + $0x60] sm:$0xff]  ;;  %v983_v23 = vld [vmem:[%s3629_s2 + $0x70] sm:$0xff] }
 0x217   :  { %v2863_v22 = vpack.c.bf16 %v982_v21, %v981_v18 }
 0x218   :  { %2371 = vmatmul.mubr.msk.f32.vlgmr.msra.gmra.mrb[4].mxu1 %vm793_vm5, %v792_v24  ;;  %v984_v24 = vld [vmem:[%s3629_s2 + $0x78] sm:$0xff] }
 0x219   :  { %2906 = vmatpush3.bf16.msra.mxu1 %v2807_v57  ;;  %2814 = vmatpush3.bf16.msra.mxu0 %v2811_v17 }
 0x21a   :  { %2908 = vmatprep.subr.bf16.mxu1 %v2811_v17  ;;  %2816 = vmatprep.subr.bf16.mxu0 %v2815_v25 }
 0x21d   :  { %2910 = vmatpush3.bf16.msra.mxu1 %v2811_v17  ;;  %2818 = vmatpush3.bf16.msra.mxu0 %v2815_v25  ;;  %v2859_v17 = vpack.c.bf16 %v980_v14, %v979_v13  ;;  %v1536_v13 = vld [vmem:[%s3632_s9 + $0x78] sm:$0xff] }
 0x21e   :  { %2912 = vmatprep.subr.bf16.mxu1 %v2815_v25  ;;  %2820 = vmatprep.subr.bf16.mxu0 %v2819_v28 }
 0x221   :  { %2914 = vmatpush3.bf16.msra.mxu1 %v2815_v25  ;;  %2822 = vmatpush3.bf16.msra.mxu0 %v2819_v28  ;;  %v2867_v25 = vpack.c.bf16 %v984_v24, %v983_v23 }
 0x222   :  { %2916 = vmatprep.subr.bf16.mxu1 %v2819_v28  ;;  %2824 = vmatprep.subr.bf16.mxu0 %v2823_v31 }
 0x225   :  { %2918 = vmatpush3.bf16.msra.mxu1 %v2819_v28  ;;  %2826 = vmatpush3.bf16.msra.mxu0 %v2823_v31  ;;  %v2871_v28 = vpack.c.bf16 %v1918_v27, %v1917_v26 }
 0x226   :  { %2920 = vmatprep.subr.bf16.mxu1 %v2823_v31  ;;  %2828 = vmatprep.subr.bf16.mxu0 %v2827_v34 }
 0x229   :  { %2922 = vmatpush3.bf16.msra.mxu1 %v2823_v31  ;;  %2830 = vmatpush3.bf16.msra.mxu0 %v2827_v34  ;;  %v1921_v31 = vld [vmem:[%s3629_s2 + $0x120] sm:$0xff] }
 0x22a   :  { %2924 = vmatprep.subr.bf16.mxu1 %v2827_v34  ;;  %2832 = vmatprep.subr.bf16.mxu0 %v2831_v37  ;;  %v2879_v38 = vpack.c.bf16 %v1922_v35, %v1921_v31 }
 0x22d   :  { %2926 = vmatpush3.bf16.msra.mxu1 %v2827_v34  ;;  %2834 = vmatpush3.bf16.msra.mxu0 %v2831_v37  ;;  %v2875_v34 = vpack.c.bf16 %v1920_v30, %v1919_v29 }
 0x22e   :  { %2928 = vmatprep.subr.bf16.mxu1 %v2831_v37  ;;  %2836 = vmatprep.subr.bf16.mxu0 %v2835_v40 }
 0x231   :  { %2930 = vmatpush3.bf16.msra.mxu1 %v2831_v37  ;;  %2838 = vmatpush3.bf16.msra.mxu0 %v2835_v40 }
 0x232   :  { %2932 = vmatprep.subr.bf16.mxu1 %v2835_v40  ;;  %2840 = vmatprep.subr.bf16.mxu0 %v2839_v43 }
 0x235   :  { %2934 = vmatpush3.bf16.msra.mxu1 %v2835_v40  ;;  %v1924_v40 = vld [vmem:[%s3629_s2 + $0x138] sm:$0xff] }
 0x236   :  { %2936 = vmatprep.subr.bf16.mxu1 %v2839_v43  ;;  %v2883_v41 = vpack.c.bf16 %v1924_v40, %v1923_v39 }
 0x2e7   :  { %v863_v47 = vpop.f32.mrb[4].mxu0 }
 0x2e8   :  { %v947_v48 = vrot.slane %v863_v47, %v3404_v46  ;;  %v2367_v49 = vpop.f32.mrb[5].mxu0  ;;  %v1928_v47 = vld [vmem:[%s3629_s2 + $0x158] sm:$0xff] }
 0x2e9   :  { %v1929_v49 = vld [vmem:[%s3629_s2 + $0x160] sm:$0xff] }
 0x2ea   :  { %v948_v50 = vmul.f32 %v947_v48, %v3323_v19  ;;  %v949_v51 = vmul.f32 %v3315_v15, %v947_v48  ;;  %v960_v52 = vmul.f32 %v947_v48, %v3325_v20  ;;  %v961_v53 = vmul.f32 %v3317_v16, %v947_v48  ;;  %v972_v15 = vld [vmem:[%s3629_s2 + $0x18] sm:$0xff] }
 0x2eb   :  { %v936_v54 = vpop.f32.mrb[4].mxu1  ;;  %v2843_v0 = vpack.c.bf16 %v972_v15, %v971_v62  ;;  %v2891_v48 = vpack.c.bf16 %v1928_v47, %v1927_v45 }
 0x2ec   :  { %v953_v55 = vrot.slane %v936_v54, %v3404_v46  ;;  %v2372_v57 = vpop.f32.mrb[5].mxu1 }
 0x2ed   :  { %v1522_v57 = vld [vmem:[%s3632_s9 + $0x8] sm:$0xff] }
 0x2ee   :  { %v954_v58 = vadd.f32 %v953_v55, %v948_v50  ;;  %v955_v59 = vadd.f32 %v953_v55, %v949_v51  ;;  %v962_v60 = vadd.f32 %v960_v52, %v953_v55  ;;  %v963_v61 = vadd.f32 %v961_v53, %v953_v55  ;;  %v1930_v50 = vld [vmem:[%s3629_s2 + $0x168] sm:$0xff]  ;;  %v1931_v52 = vld [vmem:[%s3629_s2 + $0x170] sm:$0xff]  ;;  %v1932_v53 = vld [vmem:[%s3629_s2 + $0x178] sm:$0xff] }
 0x2ef   :  { %v2895_v51 = vpack.c.bf16 %v1930_v50, %v1929_v49  ;;  %v2899_v54 = vpack.c.bf16 %v1932_v53, %v1931_v52  ;;  %v1521_v55 = vld [vmem:[%s3632_s9] sm:$0xff] }
 0x2f0   :  { %v956_v19 = vmax.f32 %v954_v58, 0.0  ;;  %v957_v20 = vmax.f32 %v955_v59, 0.0  ;;  %v964_v63 = vmax.f32 %v962_v60, 0.0  ;;  %v965_v16 = vmax.f32 %v963_v61, 0.0  ;;  %v1523_v59 = vld [vmem:[%s3632_s9 + $0x10] sm:$0xff]  ;;  %v1524_v60 = vld [vmem:[%s3632_s9 + $0x18] sm:$0xff] }
 0x2f1   :  { %v3000_v58 = vpack.c.bf16 %v1522_v57, %v1521_v55  ;;  %v3003_v15 = vpack.c.bf16 %v1524_v60, %v1523_v59 }
 0x2f2   :  { %958 = vst [vmem:[#allocation3 + $0x1] sm:$0xff] %v956_v19  ;;  %959 = vst [vmem:[#allocation3 + $0x9] sm:$0xff] %v957_v20  ;;  %2405 = vmatprep.mubr.f32.mxu0 %v956_v19  ;;  %2510 = vmatprep.mubr.f32.mxu1 %v964_v63  ;;  %v1525_v19 = vld [vmem:[%s3632_s9 + $0x20] sm:$0xff] }
 0x2f3   :  { %967 = vst [vmem:[#allocation3 + $0x19] sm:$0xff] %v964_v63  ;;  %968 = vst [vmem:[#allocation3 + $0x21] sm:$0xff] %v965_v16  ;;  %2406 = vmatmul.mubr.f32.vlgmr.msra.gmra.mrb[6].mxu0 %v957_v20  ;;  %2511 = vmatmul.mubr.f32.vlgmr.msra.gmra.mrb[6].mxu1 %v965_v16  ;;  %v1526_v20 = vld [vmem:[%s3632_s9 + $0x28] sm:$0xff]  ;;  %v1527_v16 = vld [vmem:[%s3632_s9 + $0x30] sm:$0xff] }
 0x2f4   :  { %2842 = vmatpush3.bf16.msra.mxu0 %v2839_v43  ;;  %2938 = vmatpush3.bf16.msra.mxu1 %v2839_v43  ;;  %v1926_v43 = vld [vmem:[%s3629_s2 + $0x148] sm:$0xff]  ;;  %v3006_v63 = vpack.c.bf16 %v1526_v20, %v1525_v19 }
 0x2f5   :  { %2844 = vmatprep.subr.bf16.mxu0 %v2843_v0  ;;  %2940 = vmatprep.subr.bf16.mxu1 %v2843_v0  ;;  %v2887_v44 = vpack.c.bf16 %v1926_v43, %v1925_v42 }
 0x2f8   :  { %2846 = vmatpush3.bf16.msra.mxu0 %v2843_v0  ;;  %2942 = vmatpush3.bf16.msra.mxu1 %v2843_v0  ;;  %v1528_v0 = vld [vmem:[%s3632_s9 + $0x38] sm:$0xff] }
 0x2f9   :  { %v1019_v7 = vld [vmem:[#allocation3] sm:$0xff]  ;;  %2848 = vmatprep.subr.bf16.mxu0 %v2847_v4  ;;  %2944 = vmatprep.subr.bf16.mxu1 %v2847_v4  ;;  %v1020_v32 = vld [vmem:[#allocation3 + $0x8] sm:$0xff]  ;;  %v3009_v1 = vpack.c.bf16 %v1528_v0, %v1527_v16 }
 0x2fa   :  { %v1270_v8 = vld [vmem:[#allocation3 + $0x18] sm:$0xff]  ;;  %2440 = vmatprep.mubr.f32.mxu0 %v1019_v7  ;;  %v1271_v33 = vld [vmem:[#allocation3 + $0x20] sm:$0xff]  ;;  %v1174_v61 = vld [vmem:[#allocation3 + $0xa] sm:$0xff] }
 0x2fb   :  { %2545 = vmatprep.mubr.f32.mxu1 %v1270_v8  ;;  %v1173_v36 = vld [vmem:[#allocation3 + $0x2] sm:$0xff]  ;;  %v1424_v37 = vld [vmem:[#allocation3 + $0x1a] sm:$0xff] }
 0x2fc   :  { %2850 = vmatpush3.bf16.msra.mxu0 %v2847_v4  ;;  %2946 = vmatpush3.bf16.msra.mxu1 %v2847_v4  ;;  %v1425_v62 = vld [vmem:[#allocation3 + $0x22] sm:$0xff]  ;;  %v1530_v4 = vld [vmem:[%s3632_s9 + $0x48] sm:$0xff] }
 0x2fd   :  { %2852 = vmatprep.subr.bf16.mxu0 %v2851_v9  ;;  %2948 = vmatprep.subr.bf16.mxu1 %v2851_v9  ;;  %v3012_v5 = vpack.c.bf16 %v1530_v4, %v1529_v2  ;;  %v1532_v7 = vld [vmem:[%s3632_s9 + $0x58] sm:$0xff] }
 0x2fe   :  { %v3015_v8 = vpack.c.bf16 %v1532_v7, %v1531_v6  ;;  %v1538_v6 = vld [vmem:[%s3634_s5] sm:$0x1] }
 0x300   :  { %2854 = vmatpush3.bf16.msra.mxu0 %v2851_v9  ;;  %2950 = vmatpush3.bf16.msra.mxu1 %v2851_v9  ;;  %v1533_v9 = vld [vmem:[%s3632_s9 + $0x60] sm:$0xff] }
 0x301   :  { %2856 = vmatprep.subr.bf16.mxu0 %v2855_v12  ;;  %2952 = vmatprep.subr.bf16.mxu1 %v2855_v12  ;;  %v3018_v11 = vpack.c.bf16 %v1534_v10, %v1533_v9  ;;  %v1539_v9 = vld [vmem:[%s3635_s6] sm:$0x1] }
 0x304   :  { %2858 = vmatpush3.bf16.msra.mxu0 %v2855_v12  ;;  %2954 = vmatpush3.bf16.msra.mxu1 %v2855_v12  ;;  %v1535_v12 = vld [vmem:[%s3632_s9 + $0x70] sm:$0xff] }
 0x305   :  { %2860 = vmatprep.subr.bf16.mxu0 %v2859_v17  ;;  %2956 = vmatprep.subr.bf16.mxu1 %v2859_v17  ;;  %v3021_v14 = vpack.c.bf16 %v1536_v13, %v1535_v12 }
 0x308   :  { %2862 = vmatpush3.bf16.msra.mxu0 %v2859_v17  ;;  %2958 = vmatpush3.bf16.msra.mxu1 %v2859_v17 }
 0x309   :  { %2864 = vmatprep.subr.bf16.mxu0 %v2863_v22  ;;  %2960 = vmatprep.subr.bf16.mxu1 %v2863_v22 }
 0x30c   :  { %2866 = vmatpush3.bf16.msra.mxu0 %v2863_v22  ;;  %2962 = vmatpush3.bf16.msra.mxu1 %v2863_v22 }
 0x30d   :  { %2868 = vmatprep.subr.bf16.mxu0 %v2867_v25  ;;  %2964 = vmatprep.subr.bf16.mxu1 %v2867_v25 }
 0x310   :  { %2870 = vmatpush3.bf16.msra.mxu0 %v2867_v25  ;;  %2966 = vmatpush3.bf16.msra.mxu1 %v2867_v25 }
 0x311   :  { %2872 = vmatprep.subr.bf16.mxu0 %v2871_v28  ;;  %2968 = vmatprep.subr.bf16.mxu1 %v2871_v28 }
 0x313   :  { %2441 = vmatmul.mubr.f32.vlgmr.msra.gmra.mrb[6].mxu0 %v1020_v32  ;;  %2546 = vmatmul.mubr.f32.vlgmr.msra.gmra.mrb[6].mxu1 %v1271_v33 }
 0x314   :  { %2874 = vmatpush3.bf16.msra.mxu0 %v2871_v28  ;;  %2475 = vmatprep.mubr.f32.mxu0 %v1173_v36 }
 0x315   :  { %2970 = vmatpush3.bf16.msra.mxu1 %v2871_v28  ;;  %2580 = vmatprep.mubr.f32.mxu1 %v1424_v37 }
 0x316   :  { %2876 = vmatprep.subr.bf16.mxu0 %v2875_v34  ;;  %2972 = vmatprep.subr.bf16.mxu1 %v2875_v34 }
 0x318   :  { %2878 = vmatpush3.bf16.msra.mxu0 %v2875_v34 }
 0x319   :  { %2974 = vmatpush3.bf16.msra.mxu1 %v2875_v34  ;;  %2880 = vmatprep.subr.bf16.mxu0 %v2879_v38 }
 0x31a   :  { %2976 = vmatprep.subr.bf16.mxu1 %v2879_v38 }
 0x31c   :  { %2882 = vmatpush3.bf16.msra.mxu0 %v2879_v38 }
 0x31d   :  { %2978 = vmatpush3.bf16.msra.mxu1 %v2879_v38  ;;  %2884 = vmatprep.subr.bf16.mxu0 %v2883_v41 }
 0x31e   :  { %2980 = vmatprep.subr.bf16.mxu1 %v2883_v41 }
 0x320   :  { %2886 = vmatpush3.bf16.msra.mxu0 %v2883_v41 }
 0x321   :  { %2982 = vmatpush3.bf16.msra.mxu1 %v2883_v41  ;;  %2888 = vmatprep.subr.bf16.mxu0 %v2887_v44 }
 0x322   :  { %2984 = vmatprep.subr.bf16.mxu1 %v2887_v44 }
 0x324   :  { %2890 = vmatpush3.bf16.msra.mxu0 %v2887_v44 }
 0x325   :  { %2986 = vmatpush3.bf16.msra.mxu1 %v2887_v44  ;;  %2892 = vmatprep.subr.bf16.mxu0 %v2891_v48 }
 0x326   :  { %2988 = vmatprep.subr.bf16.mxu1 %v2891_v48 }
 0x328   :  { %2894 = vmatpush3.bf16.msra.mxu0 %v2891_v48 }
 0x329   :  { %2990 = vmatpush3.bf16.msra.mxu1 %v2891_v48  ;;  %2896 = vmatprep.subr.bf16.mxu0 %v2895_v51 }
 0x32a   :  { %2992 = vmatprep.subr.bf16.mxu1 %v2895_v51 }
 0x32c   :  { %2898 = vmatpush3.bf16.msra.mxu0 %v2895_v51 }
 0x32d   :  { %2994 = vmatpush3.bf16.msra.mxu1 %v2895_v51  ;;  %2900 = vmatprep.subr.bf16.mxu0 %v2899_v54 }
 0x32e   :  { %2996 = vmatprep.subr.bf16.mxu1 %v2899_v54 }
 0x330   :  { %2902 = vmatpush3.bf16.msra.mxu0 %v2899_v54 }
 0x331   :  { %2998 = vmatpush3.bf16.msra.mxu1 %v2899_v54  ;;  %2999 = vmatprep.subr.bf16.mxu0 %v3075_v56 }
 0x332   :  { %3023 = vmatprep.subr.bf16.mxu1 %v3075_v56 }
 0x333   :  { %2476 = vmatmul.mubr.f32.vlgmr.msra.gmra.mrb[6].mxu0 %v1174_v61 }
 0x334   :  { %2581 = vmatmul.mubr.f32.vlgmr.msra.gmra.mrb[6].mxu1 %v1425_v62  ;;  %3001 = vmatpush3.bf16.msra.mxu0 %v3000_v58 }
 0x335   :  { %3025 = vmatpush3.bf16.msra.mxu1 %v3000_v58  ;;  %3002 = vmatprep.subr.bf16.mxu0 %v3075_v56  ;;  %v1537_v58 = vld [vmem:[%s3633_s10] sm:$0xff] }
 0x336   :  { %3026 = vmatprep.subr.bf16.mxu1 %v3075_v56  ;;  %2615 = vmatprep.mubr.msk.f32.mxu0 %vm3076_vm2, %v3074_v3 }
 0x337   :  { %2650 = vmatprep.mubr.msk.f32.mxu1 %vm3076_vm2, %v3074_v3 }
 0x338   :  { %3004 = vmatpush3.bf16.msra.mxu0 %v3003_v15 }
 0x339   :  { %3028 = vmatpush3.bf16.msra.mxu1 %v3003_v15  ;;  %3005 = vmatprep.subr.bf16.mxu0 %v3075_v56 }
 0x33a   :  { %3029 = vmatprep.subr.bf16.mxu1 %v3075_v56 }
 0x33c   :  { %3007 = vmatpush3.bf16.msra.mxu0 %v3006_v63 }
 0x33d   :  { %3031 = vmatpush3.bf16.msra.mxu1 %v3006_v63  ;;  %3008 = vmatprep.subr.bf16.mxu0 %v3075_v56 }
 0x33e   :  { %3032 = vmatprep.subr.bf16.mxu1 %v3075_v56 }
 0x340   :  { %3010 = vmatpush3.bf16.msra.mxu0 %v3009_v1 }
 0x341   :  { %3034 = vmatpush3.bf16.msra.mxu1 %v3009_v1  ;;  %3011 = vmatprep.subr.bf16.mxu0 %v3075_v56 }
 0x342   :  { %3035 = vmatprep.subr.bf16.mxu1 %v3075_v56 }
 0x344   :  { %3013 = vmatpush3.bf16.msra.mxu0 %v3012_v5 }
 0x345   :  { %3037 = vmatpush3.bf16.msra.mxu1 %v3012_v5  ;;  %3014 = vmatprep.subr.bf16.mxu0 %v3075_v56 }
 0x346   :  { %3038 = vmatprep.subr.bf16.mxu1 %v3075_v56 }
 0x348   :  { %3016 = vmatpush3.bf16.msra.mxu0 %v3015_v8 }
 0x349   :  { %3040 = vmatpush3.bf16.msra.mxu1 %v3015_v8  ;;  %3017 = vmatprep.subr.bf16.mxu0 %v3075_v56 }
 0x34a   :  { %3041 = vmatprep.subr.bf16.mxu1 %v3075_v56 }
 0x34c   :  { %3019 = vmatpush3.bf16.msra.mxu0 %v3018_v11 }
 0x34d   :  { %3043 = vmatpush3.bf16.msra.mxu1 %v3018_v11  ;;  %3020 = vmatprep.subr.bf16.mxu0 %v3075_v56 }
 0x34e   :  { %3044 = vmatprep.subr.bf16.mxu1 %v3075_v56 }
 0x350   :  { %3022 = vmatpush3.bf16.msra.mxu0 %v3021_v14 }
 0x351   :  { %3046 = vmatpush3.bf16.msra.mxu1 %v3021_v14  ;;  %2653 = vmatprep.subr.mxu0 %v3074_v3 }
 0x352   :  { %2658 = vmatprep.subr.mxu1 %v3074_v3 }
 0x406   :  { %v3572_v17 = vpop.f32.mrb[6].mxu0 }
 0x407   :  { %v1261_v18 = vmul.f32 %v3572_v17, %v3572_v17  ;;  %v3576_v21 = vpop.f32.mrb[6].mxu1  ;;  %v3578_v22 = vpop.f32.mrb[7].mxu0 }
 0x408   :  { %v1512_v23 = vmul.f32 %v3576_v21, %v3576_v21  ;;  %v1252_v56 = vadd.f32 %v3572_v17, %v3578_v22  ;;  %v1260_v24 = vmul.f32 %v3578_v22, %v3578_v22  ;;  %v3586_v25 = vpop.f32.mrb[7].mxu1 }
 0x409   :  { %v1503_v26 = vadd.f32 %v3576_v21, %v3586_v25  ;;  %v1511_v27 = vmul.f32 %v3586_v25, %v3586_v25 }
 0x40a   :  { %v1253_v28 = vrot.slane %v1252_v56, 4  ;;  %v1262_v29 = vadd.f32 %v1261_v18, %v1260_v24 }
 0x40b   :  { %v1504_v30 = vrot.slane %v1503_v26, 4  ;;  %v1513_v31 = vadd.f32 %v1512_v23, %v1511_v27 }
 0x40c   :  { %v1254_v32 = vadd.f32 %v1253_v28, %v1252_v56  ;;  %v1263_v33 = vrot.slane %v1262_v29, 4 }
 0x40d   :  { %v1505_v34 = vadd.f32 %v1504_v30, %v1503_v26  ;;  %v1514_v35 = vrot.slane %v1513_v31, 4 }
 0x40e   :  { %v1255_v36 = vrot.slane %v1254_v32, 2  ;;  %v1264_v37 = vadd.f32 %v1263_v33, %v1262_v29 }
 0x40f   :  { %v1506_v38 = vrot.slane %v1505_v34, 2  ;;  %v1515_v39 = vadd.f32 %v1514_v35, %v1513_v31 }
 0x410   :  { %v1256_v40 = vadd.f32 %v1255_v36, %v1254_v32  ;;  %v1265_v41 = vrot.slane %v1264_v37, 2 }
 0x411   :  { %v1507_v42 = vadd.f32 %v1506_v38, %v1505_v34  ;;  %v1516_v43 = vrot.slane %v1515_v39, 2 }
 0x412   :  { %v1257_v44 = vrot.slane %v1256_v40, 1  ;;  %v1266_v45 = vadd.f32 %v1265_v41, %v1264_v37 }
 0x413   :  { %v1508_v47 = vrot.slane %v1507_v42, 1  ;;  %v1517_v48 = vadd.f32 %v1516_v43, %v1515_v39 }
 0x414   :  { %v1258_v49 = vadd.f32 %v1257_v44, %v1256_v40  ;;  %v1267_v50 = vrot.slane %v1266_v45, 1 }
 0x415   :  { %v1509_v51 = vadd.f32 %v1508_v47, %v1507_v42  ;;  %v1518_v52 = vrot.slane %v1517_v48, 1 }
 0x416   :  { %v1268_v53 = vadd.f32 %v1267_v50, %v1266_v45 }
 0x417   :  { %v1510_v54 = vadd.f32 %v1509_v51, %v1258_v49  ;;  %v1519_v55 = vadd.f32 %v1518_v52, %v1517_v48 }
 0x419   :  { %2616 = vmatmul.mubr.f32.vlgmr.msra.gmra.mrb[8].mxu0 %v1510_v54  ;;  %v1520_v57 = vadd.f32 %v1519_v55, %v1268_v53 }
 0x41a   :  { %2655 = vmatprep.mubr.msk.f32.mxu0 %vm3076_vm2, %v3074_v3  ;;  %2654 = vmatpush3.msra.mxu0 %v1537_v58 }
 0x41b   :  { %2651 = vmatmul.mubr.f32.vlgmr.msra.gmra.mrb[8].mxu1 %v1520_v57 }
 0x41c   :  { %2660 = vmatprep.mubr.msk.f32.mxu1 %vm3076_vm2, %v3074_v3  ;;  %2659 = vmatpush3.msra.mxu1 %v1537_v58 }
 0x4ec   :  { %v1606_v59 = vpop.f32.mrb[8].mxu0 }
 0x4ed   :  { %v1680_v60 = vmul.f32 0.001953125, %v1606_v59  ;;  %v2617_v61 = vpop.f32.mrb[9].mxu0 }
 0x4ee   :  { %v1676_v62 = vpop.f32.mrb[8].mxu1 }
 0x4ef   :  { %v1682_v15 = vmul.f32 %v1680_v60, %v1680_v60  ;;  %v1681_v19 = vmul.f32 0.001953125, %v1676_v62  ;;  %v2652_v20 = vpop.f32.mrb[9].mxu1 }
 0x4f1   :  { %v1683_v63 = vsub.f32 %v1681_v19, %v1682_v15 }
 0x4f3   :  { %v1684_v16 = vmax.f32 %v1683_v63, 0.0 }
 0x4f5   :  { %v1685_v0 = vadd.f32 1e-05, %v1684_v16 }
 0x4f7   :  { %3070 = vrsqrt.f32 %v1685_v0  ;;  %vm1688_vm6 = vcmp.eq.f32.partialorder %v1685_v0, inf  ;;  %v1691_v3 = vand.u32 2147483648, %v1685_v0  ;;  %vm1690_vm7 = vcmp.eq.f32.partialorder %v1685_v0, 0.0 }
 0x501   :  { %v3071_v1 = vpop.eup %3070 }
 0x502   :  { %v1687_v2 = vmul.f32 %v3071_v1, %v1685_v0 }
 0x504   :  { %v1689_v4 = vsel %vm1688_vm6, %v1685_v0, %v1687_v2 }
 0x505   :  { %v1692_v5 = vsel %vm1690_vm7, %v1691_v3, %v1689_v4 }
 0x506   :  { %3072 = vrcp.f32 %v1692_v5 }
 0x510   :  { %v3073_v7 = vpop.eup %3072 }
 0x511   :  { %v1694_v8 = vmul.f32 %v3073_v7, %v1538_v6 }
 0x513   :  { %2656 = vmatmul.mubr.msk.f32.vlgmr.msra.gmra.mrb[10].mxu0 %vm793_vm5, %v1694_v8  ;;  %v1695_v10 = vmul.f32 %v1694_v8, %v1680_v60 }
 0x515   :  { %v1696_v11 = vsub.f32 %v1539_v9, %v1695_v10 }
 0x517   :  { %2661 = vmatmul.mubr.msk.f32.vlgmr.msra.gmra.mrb[10].mxu1 %vm793_vm5, %v1696_v11 }
 0x5e6   :  { %v1766_v12 = vpop.f32.mrb[10].mxu0 }
 0x5e7   :  { %v1846_v13 = vrot.slane %v1766_v12, %v3404_v46  ;;  %v2657_v14 = vpop.f32.mrb[11].mxu0 }
 0x5e9   :  { %v1847_v18 = vmul.f32 %v1846_v13, %v3578_v22  ;;  %v1848_v23 = vmul.f32 %v3572_v17, %v1846_v13  ;;  %v1859_v56 = vmul.f32 %v1846_v13, %v3586_v25  ;;  %v1860_v24 = vmul.f32 %v3576_v21, %v1846_v13 }
 0x5ea   :  { %v1839_v26 = vpop.f32.mrb[10].mxu1 }
 0x5eb   :  { %v1852_v27 = vrot.slane %v1839_v26, %v3404_v46  ;;  %v2662_v28 = vpop.f32.mrb[11].mxu1 }
 0x5ed   :  { %v1853_v29 = vadd.f32 %v1852_v27, %v1847_v18  ;;  %v1854_v30 = vadd.f32 %v1852_v27, %v1848_v23  ;;  %v1861_v31 = vadd.f32 %v1859_v56, %v1852_v27  ;;  %v1862_v32 = vadd.f32 %v1860_v24, %v1852_v27 }
 0x5ef   :  { %v1855_v33 = vmax.f32 %v1853_v29, 0.0  ;;  %v1856_v34 = vmax.f32 %v1854_v30, 0.0  ;;  %v1863_v35 = vmax.f32 %v1861_v31, 0.0  ;;  %v1864_v36 = vmax.f32 %v1862_v32, 0.0 }
 0x5f1   :  { %1857 = vst [vmem:[%s3636_s11] sm:$0xff] %v1855_v33  ;;  %1858 = vst [vmem:[%s3636_s11 + $0x8] sm:$0xff] %v1856_v34 }
 0x5f2   :  { %1865 = vst [vmem:[%s3636_s11 + $0x10] sm:$0xff] %v1863_v35  ;;  %1866 = vst [vmem:[%s3636_s11 + $0x18] sm:$0xff] %v1864_v36 }

</bundles_post_ra>
